<compile_context>
chip_gen: v6e
topology: v6e:2x2x1
jax: 0.10.0
libtpu: 0.0.40
codegen_flags: <defaults>
</compile_context>

<pallas_src>
import jax
import jax.numpy as jnp
from jax.experimental import pallas as pl
from jax.experimental.pallas import tpu as pltpu

LANES = 128
SUBLANES = 8


def _pick_tile(dim: int, target: int, align: int) -> int:
    """Largest tile <= target that is a multiple of `align` and divides `dim`.

    Falls back to the full dimension (always a legal Pallas block size)."""
    if dim <= target:
        return dim
    t = (target // align) * align
    while t >= align:
        if dim % t == 0:
            return t
        t -= align
    return dim


def _xw_kernel(x_ref, w_ref, o_ref):
    # xw = x @ W_pad  (MXU, f32 accumulation), stored in the compute dtype.
    o_ref[...] = jnp.dot(
        x_ref[...], w_ref[...], preferred_element_type=jnp.float32
    ).astype(o_ref.dtype)


def _adj_xw_kernel(adj_ref, xw_ref, b_ref, o_ref, acc_ref):
    # out[i] = sum_k adj[i, k] @ xw[k]  + bias     (reduction axis = grid axis 1)
    k = pl.program_id(1)

    @pl.when(k == 0)
    def _():
        acc_ref[...] = jnp.zeros_like(acc_ref)

    acc_ref[...] += jnp.dot(
        adj_ref[...], xw_ref[...], preferred_element_type=jnp.float32
    )

    @pl.when(k == pl.num_programs(1) - 1)
    def _():
        o_ref[...] = (acc_ref[...] + b_ref[...]).astype(o_ref.dtype)


def graph_convolution(x, adj, weight, bias, *, compute_dtype=jnp.float32,
                      tm_target=256, tk_target=512, tr_target=256):
    """out = adj @ x @ weight + bias  (computed as adj @ (x @ weight) + bias)."""
    n, d_in = x.shape
    d_out = weight.shape[1]
    d_pad = ((d_out + LANES - 1) // LANES) * LANES  # lane-dense output width

    # Zero-pad weight/bias along the output dim; extra columns stay exactly 0.
    w_pad = jnp.zeros((d_in, d_pad), weight.dtype).at[:, :d_out].set(weight)
    b_pad = jnp.zeros((1, d_pad), jnp.float32).at[:, :d_out].set(
        bias.astype(jnp.float32))

    adj_c = adj.astype(compute_dtype)
    x_c = x.astype(compute_dtype)
    w_c = w_pad.astype(compute_dtype)
    itemsize = jnp.dtype(compute_dtype).itemsize

    # ---------------- kernel 1: xw = x @ W_pad (tiled over rows) -------------
    tr = _pick_tile(n, tr_target, SUBLANES)
    xw = pl.pallas_call(
        _xw_kernel,
        out_shape=jax.ShapeDtypeStruct((n, d_pad), compute_dtype),
        grid=(n // tr,),
        in_specs=[
            pl.BlockSpec((tr, d_in), lambda i: (i, 0)),     # x row tile
            pl.BlockSpec((d_in, d_pad), lambda i: (0, 0)),  # full padded weight
        ],
        out_specs=pl.BlockSpec((tr, d_pad), lambda i: (i, 0)),
        compiler_params=pltpu.CompilerParams(
            dimension_semantics=("parallel",)),
        cost_estimate=pl.CostEstimate(
            flops=2 * n * d_in * d_pad,
            transcendentals=0,
            bytes_accessed=int(n * d_in * itemsize + d_in * d_pad * itemsize
                               + n * d_pad * itemsize)),
    )(x_c, w_c)

    # -------- kernel 2: out = adj @ xw + bias (row tiles x k tiles) ----------
    tm = _pick_tile(n, tm_target, SUBLANES)   # adjacency row tile
    tk = _pick_tile(n, tk_target, LANES)      # reduction (adj column) tile

    # VMEM budget: double-buffered inputs/output + f32 accumulator scratch.
    vmem_est = 2 * (tm * tk * itemsize          # adj tile
                    + tk * d_pad * itemsize     # xw tile
                    + tm * d_pad * 4            # output tile
                    + d_pad * 4)                # bias
    vmem_est += tm * d_pad * 4                  # accumulator
    vmem_limit = int(min(96 * 1024 * 1024, max(2 * vmem_est, 16 * 1024 * 1024)))

    out_pad = pl.pallas_call(
        _adj_xw_kernel,
        out_shape=jax.ShapeDtypeStruct((n, d_pad), jnp.float32),
        grid=(n // tm, n // tk),                       # reduction axis last
        in_specs=[
            pl.BlockSpec((tm, tk), lambda i, k: (i, k)),      # adj
            pl.BlockSpec((tk, d_pad), lambda i, k: (k, 0)),   # xw
            pl.BlockSpec((1, d_pad), lambda i, k: (0, 0)),    # bias
        ],
        out_specs=pl.BlockSpec((tm, d_pad), lambda i, k: (i, 0)),
        scratch_shapes=[pltpu.VMEM((tm, d_pad), jnp.float32)],
        compiler_params=pltpu.CompilerParams(
            dimension_semantics=("parallel", "arbitrary"),
            vmem_limit_bytes=vmem_limit),
        cost_estimate=pl.CostEstimate(
            flops=2 * n * n * d_pad,
            transcendentals=0,
            bytes_accessed=int(n * n * itemsize + n * d_pad * itemsize
                               + d_pad * 4 + n * d_pad * 4)),
    )(adj_c, xw, b_pad)

    return out_pad[:, :d_out]                   # drop lane padding


def _rel_err(a, b):
    return float(jnp.linalg.norm(a - b) / (jnp.linalg.norm(b) + 1e-30))


if __name__ == "__main__":
    # Shapes consistent with the module: input_dim = 32*32*3, output_dim = 10.
    N, D_IN, D_OUT = 64, 32 * 32 * 3, 10

    key = jax.random.PRNGKey(0)
    k_x, k_adj, k_w, k_b, k2 = jax.random.split(key, 5)

    x = jax.random.normal(k_x, (N, D_IN), dtype=jnp.float32)
    adj = jax.random.uniform(k_adj, (N, N), dtype=jnp.float32)
    weight = jax.random.normal(k_w, (D_IN, D_OUT), dtype=jnp.float32) * 0.05
    bias = jax.random.normal(k_b, (D_OUT,), dtype=jnp.float32) * 0.1

    ref = adj @ x @ weight + bias

    # f32 compute path (matches PyTorch math; reassociation only changes
    # rounding order).
    out_f32 = jax.block_until_ready(graph_convolution(x, adj, weight, bias))
    assert out_f32.shape == (N, D_OUT)
    assert _rel_err(out_f32, ref) < 1e-5, _rel_err(out_f32, ref)

    # bf16-input path (v6e/v7x MXU-friendly), f32 accumulation -> looser check.
    out_bf16 = jax.block_until_ready(
        graph_convolution(x, adj, weight, bias, compute_dtype=jnp.bfloat16))
    assert out_bf16.shape == (N, D_OUT)
    assert _rel_err(out_bf16, ref) < 5e-2, _rel_err(out_bf16, ref)

    # Larger (still small) case that actually exercises the tiled grid:
    # grid = (N2//256, N2//512) = (4, 2).
    N2, D_IN2 = 1024, 256
    kx2, ka2, kw2 = jax.random.split(k2, 3)
    x2 = jax.random.normal(kx2, (N2, D_IN2), dtype=jnp.float32)
    adj2 = jax.random.uniform(ka2, (N2, N2), dtype=jnp.float32)
    w2 = jax.random.normal(kw2, (D_IN2, D_OUT), dtype=jnp.float32) * 0.05
    ref2 = adj2 @ x2 @ w2 + bias
    out2 = jax.block_until_ready(graph_convolution(x2, adj2, w2, bias))
    assert out2.shape == (N2, D_OUT)
    assert _rel_err(out2, ref2) < 1e-5, _rel_err(out2, ref2)

    print("KERNEL_OK")
</pallas_src>

<mosaic_0001>
module attributes {stable_mosaic.version = 11 : i64} {
  func.func @_xw_kernel(%arg0: i32, %arg1: memref<64x3072xf32, #tpu.memory_space<vmem>>, %arg2: memref<3072x128xf32, #tpu.memory_space<vmem>>, %arg3: memref<64x128xf32, #tpu.memory_space<vmem>>) attributes {dimension_semantics = [#tpu.dimension_semantics<parallel>], iteration_bounds = array<i64: 1>, scalar_prefetch = 0 : i64, scratch_operands = 0 : i64, tpu.core_type = #tpu.core_type<tc>, window_params = [{transform_indices = @transform_0, window_bounds = array<i64: 64, 3072>}, {pipeline_mode = #tpu.pipeline_mode<synchronous>, transform_indices = @transform_1, window_bounds = array<i64: 3072, 128>}, {transform_indices = @transform_2, window_bounds = array<i64: 64, 128>}]} {
    %c0 = arith.constant 0 : index
    %c0_0 = arith.constant 0 : index
    %0 = vector.load %arg1[%c0, %c0_0] : memref<64x3072xf32, #tpu.memory_space<vmem>>, vector<64x3072xf32>
    %c0_1 = arith.constant 0 : index
    %c0_2 = arith.constant 0 : index
    %1 = vector.load %arg2[%c0_1, %c0_2] : memref<3072x128xf32, #tpu.memory_space<vmem>>, vector<3072x128xf32>
    %cst = arith.constant dense<0.000000e+00> : vector<64x128xf32>
    %2 = tpu.matmul %0, %1, %cst {dimension_numbers = #tpu.dot_dimension_numbers<[1], [0], [0], [1], [0, 0, 1, 1], [], []>} : vector<64x3072xf32>, vector<3072x128xf32>, vector<64x128xf32> -> vector<64x128xf32>
    %c0_3 = arith.constant 0 : index
    %c0_4 = arith.constant 0 : index
    %3 = vector.load %arg3[%c0_3, %c0_4] : memref<64x128xf32, #tpu.memory_space<vmem>>, vector<64x128xf32>
    tpu.vector_store %arg3[%c0_3, %c0_4], %2 {strides = array<i32>} : memref<64x128xf32, #tpu.memory_space<vmem>>, vector<64x128xf32>,
    return
  }
  func.func @transform_0(%arg0: i32) -> (i32, i32) {
    %c0_i32 = arith.constant 0 : i32
    %c0_i32_0 = arith.constant 0 : i32
    return %arg0, %c0_i32 : i32, i32
  }
  func.func @transform_1(%arg0: i32) -> (i32, i32) {
    %c0_i32 = arith.constant 0 : i32
    %c0_i32_0 = arith.constant 0 : i32
    %c0_i32_1 = arith.constant 0 : i32
    return %c0_i32, %c0_i32_0 : i32, i32
  }
  func.func @transform_2(%arg0: i32) -> (i32, i32) {
    %c0_i32 = arith.constant 0 : i32
    %c0_i32_0 = arith.constant 0 : i32
    return %arg0, %c0_i32 : i32, i32
  }
}

</mosaic_0001>

<bundles_post_ra>
// kernel: tpu_custom_call.1
= control target key start
LH: loop header
LB: loop body
LE: loop exit
PB: predicated region body
PF: predicated region fallthrough
CT: control target
= control target key end

     0   :  { %7 = vsyncpa [#allocation3], 0  ;;  %s2873_s0 = inlined_call_operand.hbm [shape: f32[64,3072], index: 0, kind: input, shape index: {}]   ;;  %s2874_s1 = inlined_call_operand.hbm [shape: f32[3072,128], index: 1, kind: input, shape index: {}]   ;;  %s2875_s2 = inlined_call_operand.hbm [shape: f32[64,128], index: 2, kind: output, shape index: {}]  }
   0x1   :  { %8 = vsyncpa [#allocation6], 0 }
   0x2   :  { %9 = vsyncpa [#allocation4], 0  ;;  %s2647_s9 = smov [#allocation2]  }
   0x3   :  { %s15_s10 = sshll.u32 %s2647_s9, 4  ;;  %s16_s10 = int_to_ptr.vmem [resolvable:$true] %s15_s10 }
   0x4   :  { %s2589_s11 = scalar_lea.vmem %s16_s10, 24576  ;;  %p2594_p1 = scmp.lt.s32.totalorder %s16_s10, %s16_s10 }
   0x5   :  { %p2590_p0 = scmp.ne.s32.totalorder %s16_s10, %s2589_s11  ;;  %p2595_p2 = scmp.lt.s32.totalorder %s2589_s11, %s2589_s11 }
   0x7   :  { %p2596_p3 = por %p2595_p2, %p2594_p1 }
   0x9   :  { %p2597_p4 = pnand %p2596_p3, %p2590_p0 }
   0xb   :  { %2600 = shalt.err (!%p2597_p4)
}
   0xc   :  { %s2648_s12 = smov 3072   ;;  %s2649_s13 = smov 192  }
   0xd   :  { %21 = dma.hbm_to_vmem [thread:$0]  %s2873_s0, 24576, %s16_s10, [#allocation3], %s2648_s12, %s2648_s12, %s2649_s13  }
   0xe   :  { %s2650_s16 = smov [#allocation5]  }
   0xf   :  { %s27_s17 = sshll.u32 %s2650_s16, 4  ;;  %s28_s17 = int_to_ptr.vmem [resolvable:$true] %s27_s17 }
  0x10   :  { %s2609_s18 = scalar_lea.vmem %s28_s17, 49152  ;;  %p2614_p6 = scmp.lt.s32.totalorder %s28_s17, %s28_s17 }
  0x11   :  { %p2610_p5 = scmp.ne.s32.totalorder %s28_s17, %s2609_s18  ;;  %p2615_p7 = scmp.lt.s32.totalorder %s2609_s18, %s2609_s18 }
  0x13   :  { %p2616_p8 = por %p2615_p7, %p2614_p6 }
  0x15   :  { %p2617_p9 = pnand %p2616_p8, %p2610_p5 }
  0x17   :  { %2620 = shalt.err (!%p2617_p9)
}
  0x18   :  { %s2651_s19 = smov 128   ;;  %s2652_s20 = smov 8  }
  0x19   :  { %33 = dma.hbm_to_vmem [thread:$0]  %s2874_s1, 49152, %s28_s17, [#allocation6], %s2651_s19, %s2651_s19, %s2652_s20  }
  0x1a   :  { %2641 = dma.done.wait [#allocation3], 24576  }
  0x1b   :  { %2642 = vsyncadd [#allocation3], 4294942720 }
  0x1c   :  { %2643 = dma.done.wait [#allocation6], 49152  }
  0x1d   :  { %2644 = vsyncadd [#allocation6], 4294918144  ;;  %v263_v0 = vld [vmem:[#allocation5 + $0xf8] sm:$0xff]  ;;  %v262_v4 = vld [vmem:[#allocation5 + $0xf0] sm:$0xff]  ;;  %s2653_s0 = smov [#allocation7]  }
  0x1e   :  { %v295_v1 = vld [vmem:[#allocation5 + $0x1f8] sm:$0xff]  ;;  %1902 = vmatprep.subr.mxu0 %v263_v0  ;;  %v294_v5 = vld [vmem:[#allocation5 + $0x1f0] sm:$0xff]  ;;  %v261_v8 = vld [vmem:[#allocation5 + $0xe8] sm:$0xff]  ;;  %s1889_s1 = sshll.u32 %s2653_s0, 4  ;;  %s1890_s1 = int_to_ptr.vmem [resolvable:$true] %s1889_s1 }
  0x1f   :  { %v247_v2 = vld [vmem:[#allocation5 + $0x78] sm:$0xff]  ;;  %1958 = vmatprep.subr.mxu1 %v295_v1  ;;  %v246_v6 = vld [vmem:[#allocation5 + $0x70] sm:$0xff]  ;;  %v293_v9 = vld [vmem:[#allocation5 + $0x1e8] sm:$0xff]  ;;  %s2621_s23 = scalar_lea.vmem %s1890_s1, 1024  ;;  %p2626_p11 = scmp.lt.s32.totalorder %s1890_s1, %s1890_s1 }
  0x20   :  { %v279_v3 = vld [vmem:[#allocation5 + $0x178] sm:$0xff]  ;;  %1903 = vmatpush3.msra.mxu0 %v247_v2  ;;  %v278_v7 = vld [vmem:[#allocation5 + $0x170] sm:$0xff]  ;;  %v245_v10 = vld [vmem:[#allocation5 + $0x68] sm:$0xff]  ;;  %p2622_p10 = scmp.ne.s32.totalorder %s1890_s1, %s2621_s23  ;;  %p2627_p12 = scmp.lt.s32.totalorder %s2621_s23, %s2621_s23 }
  0x21   :  { %1959 = vmatpush3.msra.mxu1 %v279_v3  ;;  %1904 = vmatprep.subr.mxu0 %v262_v4  ;;  %v277_v11 = vld [vmem:[#allocation5 + $0x168] sm:$0xff]  ;;  %v260_v12 = vld [vmem:[#allocation5 + $0xe0] sm:$0xff]  ;;  %v259_v16 = vld [vmem:[#allocation5 + $0xd8] sm:$0xff] }
  0x22   :  { %1960 = vmatprep.subr.mxu1 %v294_v5  ;;  %1905 = vmatpush3.msra.mxu0 %v246_v6  ;;  %v292_v13 = vld [vmem:[#allocation5 + $0x1e0] sm:$0xff]  ;;  %v291_v17 = vld [vmem:[#allocation5 + $0x1d8] sm:$0xff]  ;;  %v258_v20 = vld [vmem:[#allocation5 + $0xd0] sm:$0xff]  ;;  %p2628_p13 = por %p2627_p12, %p2626_p11 }
  0x23   :  { %1961 = vmatpush3.msra.mxu1 %v278_v7  ;;  %1906 = vmatprep.subr.mxu0 %v261_v8  ;;  %v244_v14 = vld [vmem:[#allocation5 + $0x60] sm:$0xff]  ;;  %v243_v18 = vld [vmem:[#allocation5 + $0x58] sm:$0xff]  ;;  %v290_v21 = vld [vmem:[#allocation5 + $0x1d0] sm:$0xff] }
  0x24   :  { %1962 = vmatprep.subr.mxu1 %v293_v9  ;;  %v276_v15 = vld [vmem:[#allocation5 + $0x160] sm:$0xff]  ;;  %1907 = vmatpush3.msra.mxu0 %v245_v10  ;;  %v275_v19 = vld [vmem:[#allocation5 + $0x158] sm:$0xff]  ;;  %v242_v22 = vld [vmem:[#allocation5 + $0x50] sm:$0xff]  ;;  %p2629_p0 = pnand %p2628_p13, %p2622_p10 }
  0x25   :  { %1963 = vmatpush3.msra.mxu1 %v277_v11  ;;  %1908 = vmatprep.subr.mxu0 %v260_v12  ;;  %v274_v23 = vld [vmem:[#allocation5 + $0x150] sm:$0xff]  ;;  %v257_v24 = vld [vmem:[#allocation5 + $0xc8] sm:$0xff]  ;;  %v256_v28 = vld [vmem:[#allocation5 + $0xc0] sm:$0xff] }
  0x26   :  { %1964 = vmatprep.subr.mxu1 %v292_v13  ;;  %1909 = vmatpush3.msra.mxu0 %v244_v14  ;;  %v289_v25 = vld [vmem:[#allocation5 + $0x1c8] sm:$0xff]  ;;  %v288_v29 = vld [vmem:[#allocation5 + $0x1c0] sm:$0xff]  ;;  %v255_v32 = vld [vmem:[#allocation5 + $0xb8] sm:$0xff] }
  0x27   :  { %1965 = vmatpush3.msra.mxu1 %v276_v15  ;;  %1910 = vmatprep.subr.mxu0 %v259_v16  ;;  %v241_v26 = vld [vmem:[#allocation5 + $0x48] sm:$0xff]  ;;  %v240_v30 = vld [vmem:[#allocation5 + $0x40] sm:$0xff]  ;;  %v287_v33 = vld [vmem:[#allocation5 + $0x1b8] sm:$0xff] }
  0x28   :  { %1966 = vmatprep.subr.mxu1 %v291_v17  ;;  %1911 = vmatpush3.msra.mxu0 %v243_v18  ;;  %v273_v27 = vld [vmem:[#allocation5 + $0x148] sm:$0xff]  ;;  %v272_v31 = vld [vmem:[#allocation5 + $0x140] sm:$0xff]  ;;  %v239_v34 = vld [vmem:[#allocation5 + $0x38] sm:$0xff] }
  0x29   :  { %1967 = vmatpush3.msra.mxu1 %v275_v19  ;;  %1912 = vmatprep.subr.mxu0 %v258_v20  ;;  %v271_v35 = vld [vmem:[#allocation5 + $0x138] sm:$0xff]  ;;  %v254_v36 = vld [vmem:[#allocation5 + $0xb0] sm:$0xff]  ;;  %v253_v40 = vld [vmem:[#allocation5 + $0xa8] sm:$0xff] }
  0x2a   :  { %1968 = vmatprep.subr.mxu1 %v290_v21  ;;  %1913 = vmatpush3.msra.mxu0 %v242_v22  ;;  %v286_v37 = vld [vmem:[#allocation5 + $0x1b0] sm:$0xff]  ;;  %v285_v41 = vld [vmem:[#allocation5 + $0x1a8] sm:$0xff]  ;;  %v252_v44 = vld [vmem:[#allocation5 + $0xa0] sm:$0xff] }
  0x2b   :  { %1969 = vmatpush3.msra.mxu1 %v274_v23  ;;  %1914 = vmatprep.subr.mxu0 %v257_v24  ;;  %v238_v38 = vld [vmem:[#allocation5 + $0x30] sm:$0xff]  ;;  %v237_v42 = vld [vmem:[#allocation5 + $0x28] sm:$0xff]  ;;  %v284_v45 = vld [vmem:[#allocation5 + $0x1a0] sm:$0xff] }
  0x2c   :  { %1970 = vmatprep.subr.mxu1 %v289_v25  ;;  %1915 = vmatpush3.msra.mxu0 %v241_v26  ;;  %v270_v39 = vld [vmem:[#allocation5 + $0x130] sm:$0xff]  ;;  %v269_v43 = vld [vmem:[#allocation5 + $0x128] sm:$0xff]  ;;  %v236_v46 = vld [vmem:[#allocation5 + $0x20] sm:$0xff] }
  0x2d   :  { %1971 = vmatpush3.msra.mxu1 %v273_v27  ;;  %1916 = vmatprep.subr.mxu0 %v256_v28  ;;  %v268_v47 = vld [vmem:[#allocation5 + $0x120] sm:$0xff]  ;;  %v251_v48 = vld [vmem:[#allocation5 + $0x98] sm:$0xff]  ;;  %v250_v52 = vld [vmem:[#allocation5 + $0x90] sm:$0xff] }
  0x2e   :  { %1972 = vmatprep.subr.mxu1 %v288_v29  ;;  %1917 = vmatpush3.msra.mxu0 %v240_v30  ;;  %v283_v49 = vld [vmem:[#allocation5 + $0x198] sm:$0xff]  ;;  %v282_v53 = vld [vmem:[#allocation5 + $0x190] sm:$0xff]  ;;  %v249_v56 = vld [vmem:[#allocation5 + $0x88] sm:$0xff] }
  0x2f   :  { %1973 = vmatpush3.msra.mxu1 %v272_v31  ;;  %1918 = vmatprep.subr.mxu0 %v255_v32  ;;  %v235_v50 = vld [vmem:[#allocation5 + $0x18] sm:$0xff]  ;;  %v234_v54 = vld [vmem:[#allocation5 + $0x10] sm:$0xff]  ;;  %v281_v57 = vld [vmem:[#allocation5 + $0x188] sm:$0xff] }
  0x30   :  { %1974 = vmatprep.subr.mxu1 %v287_v33  ;;  %1919 = vmatpush3.msra.mxu0 %v239_v34  ;;  %v267_v51 = vld [vmem:[#allocation5 + $0x118] sm:$0xff]  ;;  %v266_v55 = vld [vmem:[#allocation5 + $0x110] sm:$0xff]  ;;  %v233_v58 = vld [vmem:[#allocation5 + $0x8] sm:$0xff] }
  0x31   :  { %1975 = vmatpush3.msra.mxu1 %v271_v35  ;;  %1920 = vmatprep.subr.mxu0 %v254_v36  ;;  %v265_v59 = vld [vmem:[#allocation5 + $0x108] sm:$0xff]  ;;  %v248_v60 = vld [vmem:[#allocation5 + $0x80] sm:$0xff]  ;;  %v43_v1 = vld [vmem:[#allocation2 + $0x18] sm:$0xff] }
  0x32   :  { %1976 = vmatprep.subr.mxu1 %v286_v37  ;;  %1921 = vmatpush3.msra.mxu0 %v238_v38  ;;  %v280_v61 = vld [vmem:[#allocation5 + $0x180] sm:$0xff]  ;;  %v41_v63 = vld [vmem:[#allocation2 + $0x8] sm:$0xff]  ;;  %v42_v3 = vld [vmem:[#allocation2 + $0x10] sm:$0xff] }
  0x33   :  { %1977 = vmatpush3.msra.mxu1 %v270_v39  ;;  %1922 = vmatprep.subr.mxu0 %v253_v40  ;;  %v232_v62 = vld [vmem:[#allocation5] sm:$0xff]  ;;  %v327_v4 = vld [vmem:[#allocation5 + $0x2f8] sm:$0xff]  ;;  %v326_v8 = vld [vmem:[#allocation5 + $0x2f0] sm:$0xff] }
  0x34   :  { %1978 = vmatprep.subr.mxu1 %v285_v41  ;;  %1923 = vmatpush3.msra.mxu0 %v237_v42  ;;  %v264_v0 = vld [vmem:[#allocation5 + $0x100] sm:$0xff]  ;;  %v359_v5 = vld [vmem:[#allocation5 + $0x3f8] sm:$0xff]  ;;  %v65_v9 = vld [vmem:[#allocation2 + $0xc8] sm:$0xff] }
  0x35   :  { %1979 = vmatpush3.msra.mxu1 %v269_v43  ;;  %1924 = vmatprep.subr.mxu0 %v252_v44  ;;  %v40_v2 = vld [vmem:[#allocation2] sm:$0xff]  ;;  %v311_v6 = vld [vmem:[#allocation5 + $0x278] sm:$0xff]  ;;  %v310_v11 = vld [vmem:[#allocation5 + $0x270] sm:$0xff] }
  0x36   :  { %1980 = vmatprep.subr.mxu1 %v284_v45  ;;  %1925 = vmatpush3.msra.mxu0 %v236_v46  ;;  %v343_v7 = vld [vmem:[#allocation5 + $0x378] sm:$0xff]  ;;  %v358_v12 = vld [vmem:[#allocation5 + $0x3f0] sm:$0xff]  ;;  %v64_v13 = vld [vmem:[#allocation2 + $0xc0] sm:$0xff] }
  0x37   :  { %1981 = vmatpush3.msra.mxu1 %v268_v47  ;;  %1926 = vmatprep.subr.mxu0 %v251_v48  ;;  %v67_v10 = vld [vmem:[#allocation2 + $0xd8] sm:$0xff]  ;;  %v66_v14 = vld [vmem:[#allocation2 + $0xd0] sm:$0xff]  ;;  %v325_v15 = vld [vmem:[#allocation5 + $0x2e8] sm:$0xff] }
  0x38   :  { %1982 = vmatprep.subr.mxu1 %v283_v49  ;;  %1927 = vmatpush3.msra.mxu0 %v235_v50  ;;  %v342_v16 = vld [vmem:[#allocation5 + $0x370] sm:$0xff]  ;;  %v309_v17 = vld [vmem:[#allocation5 + $0x268] sm:$0xff]  ;;  %v324_v19 = vld [vmem:[#allocation5 + $0x2e0] sm:$0xff] }
  0x39   :  { %1983 = vmatpush3.msra.mxu1 %v267_v51  ;;  %1928 = vmatprep.subr.mxu0 %v250_v52  ;;  %v357_v18 = vld [vmem:[#allocation5 + $0x3e8] sm:$0xff]  ;;  %v91_v22 = vld [vmem:[#allocation2 + $0x198] sm:$0xff]  ;;  %v308_v23 = vld [vmem:[#allocation5 + $0x260] sm:$0xff] }
  0x3a   :  { %1984 = vmatprep.subr.mxu1 %v282_v53  ;;  %1929 = vmatpush3.msra.mxu0 %v234_v54  ;;  %v341_v20 = vld [vmem:[#allocation5 + $0x368] sm:$0xff]  ;;  %v356_v24 = vld [vmem:[#allocation5 + $0x3e0] sm:$0xff]  ;;  %v90_v26 = vld [vmem:[#allocation2 + $0x190] sm:$0xff] }
  0x3b   :  { %1985 = vmatpush3.msra.mxu1 %v266_v55  ;;  %1930 = vmatprep.subr.mxu0 %v249_v56  ;;  %v89_v21 = vld [vmem:[#allocation2 + $0x188] sm:$0xff]  ;;  %v88_v25 = vld [vmem:[#allocation2 + $0x180] sm:$0xff]  ;;  %v323_v27 = vld [vmem:[#allocation5 + $0x2d8] sm:$0xff] }
  0x3c   :  { %1986 = vmatprep.subr.mxu1 %v281_v57  ;;  %1931 = vmatpush3.msra.mxu0 %v233_v58  ;;  %v340_v28 = vld [vmem:[#allocation5 + $0x360] sm:$0xff]  ;;  %v307_v29 = vld [vmem:[#allocation5 + $0x258] sm:$0xff]  ;;  %v322_v31 = vld [vmem:[#allocation5 + $0x2d0] sm:$0xff] }
  0x3d   :  { %1987 = vmatpush3.msra.mxu1 %v265_v59  ;;  %1932 = vmatprep.subr.mxu0 %v248_v60  ;;  %v355_v30 = vld [vmem:[#allocation5 + $0x3d8] sm:$0xff]  ;;  %v113_v33 = vld [vmem:[#allocation2 + $0x248] sm:$0xff]  ;;  %v306_v35 = vld [vmem:[#allocation5 + $0x250] sm:$0xff] }
  0x3e   :  { %1988 = vmatprep.subr.mxu1 %v280_v61  ;;  %1933 = vmatpush3.msra.mxu0 %v232_v62  ;;  %v339_v32 = vld [vmem:[#allocation5 + $0x358] sm:$0xff]  ;;  %v354_v36 = vld [vmem:[#allocation5 + $0x3d0] sm:$0xff]  ;;  %v112_v37 = vld [vmem:[#allocation2 + $0x240] sm:$0xff] }
  0x3f   :  { %680 = vmatprep.mubr.f32.mxu0 %v41_v63  ;;  %1989 = vmatpush3.msra.mxu1 %v264_v0  ;;  %v115_v34 = vld [vmem:[#allocation2 + $0x258] sm:$0xff]  ;;  %v114_v38 = vld [vmem:[#allocation2 + $0x250] sm:$0xff]  ;;  %v321_v39 = vld [vmem:[#allocation5 + $0x2c8] sm:$0xff] }
  0x40   :  { %785 = vmatprep.mubr.f32.mxu1 %v43_v1  ;;  %681 = vmatmul.mubr.f32.vlgmr.msra.gmra.mxu0 %v40_v2  ;;  %v338_v40 = vld [vmem:[#allocation5 + $0x350] sm:$0xff]  ;;  %v305_v41 = vld [vmem:[#allocation5 + $0x248] sm:$0xff]  ;;  %v320_v43 = vld [vmem:[#allocation5 + $0x2c0] sm:$0xff] }
  0x41   :  { %786 = vmatmul.mubr.f32.vlgmr.msra.gmra.mxu1 %v42_v3  ;;  %2014 = vmatprep.subr.mxu0 %v327_v4  ;;  %v353_v42 = vld [vmem:[#allocation5 + $0x3c8] sm:$0xff]  ;;  %v139_v46 = vld [vmem:[#allocation2 + $0x318] sm:$0xff]  ;;  %v304_v47 = vld [vmem:[#allocation5 + $0x240] sm:$0xff] }
  0x42   :  { %2070 = vmatprep.subr.mxu1 %v359_v5  ;;  %2015 = vmatpush3.msra.mxu0 %v311_v6  ;;  %v337_v44 = vld [vmem:[#allocation5 + $0x348] sm:$0xff]  ;;  %v352_v48 = vld [vmem:[#allocation5 + $0x3c0] sm:$0xff]  ;;  %v138_v50 = vld [vmem:[#allocation2 + $0x310] sm:$0xff] }
  0x43   :  { %2071 = vmatpush3.msra.mxu1 %v343_v7  ;;  %2016 = vmatprep.subr.mxu0 %v326_v8  ;;  %v137_v45 = vld [vmem:[#allocation2 + $0x308] sm:$0xff]  ;;  %v136_v49 = vld [vmem:[#allocation2 + $0x300] sm:$0xff]  ;;  %v319_v51 = vld [vmem:[#allocation5 + $0x2b8] sm:$0xff] }
  0x44   :  { %685 = vmatprep.mubr.f32.mxu0 %v65_v9  ;;  %790 = vmatprep.mubr.f32.mxu1 %v67_v10  ;;  %v336_v52 = vld [vmem:[#allocation5 + $0x340] sm:$0xff]  ;;  %v303_v53 = vld [vmem:[#allocation5 + $0x238] sm:$0xff]  ;;  %v318_v55 = vld [vmem:[#allocation5 + $0x2b0] sm:$0xff] }
  0x45   :  { %2017 = vmatpush3.msra.mxu0 %v310_v11  ;;  %2072 = vmatprep.subr.mxu1 %v358_v12  ;;  %v351_v54 = vld [vmem:[#allocation5 + $0x3b8] sm:$0xff]  ;;  %v161_v57 = vld [vmem:[#allocation2 + $0x3c8] sm:$0xff]  ;;  %v302_v59 = vld [vmem:[#allocation5 + $0x230] sm:$0xff] }
  0x46   :  { %686 = vmatmul.mubr.f32.gmra.mxu0 %v64_v13  ;;  %791 = vmatmul.mubr.f32.gmra.mxu1 %v66_v14  ;;  %v335_v56 = vld [vmem:[#allocation5 + $0x338] sm:$0xff]  ;;  %v350_v60 = vld [vmem:[#allocation5 + $0x3b0] sm:$0xff]  ;;  %v160_v61 = vld [vmem:[#allocation2 + $0x3c0] sm:$0xff] }
  0x47   :  { %2018 = vmatprep.subr.mxu0 %v325_v15  ;;  %2073 = vmatpush3.msra.mxu1 %v342_v16  ;;  %v163_v58 = vld [vmem:[#allocation2 + $0x3d8] sm:$0xff]  ;;  %v162_v62 = vld [vmem:[#allocation2 + $0x3d0] sm:$0xff]  ;;  %v317_v63 = vld [vmem:[#allocation5 + $0x2a8] sm:$0xff] }
  0x48   :  { %2019 = vmatpush3.msra.mxu0 %v309_v17  ;;  %2074 = vmatprep.subr.mxu1 %v357_v18  ;;  %v334_v0 = vld [vmem:[#allocation5 + $0x330] sm:$0xff]  ;;  %v301_v1 = vld [vmem:[#allocation5 + $0x228] sm:$0xff]  ;;  %v316_v3 = vld [vmem:[#allocation5 + $0x2a0] sm:$0xff] }
  0x49   :  { %2020 = vmatprep.subr.mxu0 %v324_v19  ;;  %2075 = vmatpush3.msra.mxu1 %v341_v20  ;;  %v349_v2 = vld [vmem:[#allocation5 + $0x3a8] sm:$0xff]  ;;  %v187_v6 = vld [vmem:[#allocation2 + $0x498] sm:$0xff]  ;;  %v300_v7 = vld [vmem:[#allocation5 + $0x220] sm:$0xff] }
  0x4a   :  { %690 = vmatprep.mubr.f32.mxu0 %v89_v21  ;;  %795 = vmatprep.mubr.f32.mxu1 %v91_v22  ;;  %v333_v4 = vld [vmem:[#allocation5 + $0x328] sm:$0xff]  ;;  %v348_v8 = vld [vmem:[#allocation5 + $0x3a0] sm:$0xff]  ;;  %v186_v10 = vld [vmem:[#allocation2 + $0x490] sm:$0xff] }
  0x4b   :  { %2021 = vmatpush3.msra.mxu0 %v308_v23  ;;  %2076 = vmatprep.subr.mxu1 %v356_v24  ;;  %v185_v5 = vld [vmem:[#allocation2 + $0x488] sm:$0xff]  ;;  %v184_v9 = vld [vmem:[#allocation2 + $0x480] sm:$0xff]  ;;  %v315_v11 = vld [vmem:[#allocation5 + $0x298] sm:$0xff] }
  0x4c   :  { %691 = vmatmul.mubr.f32.gmra.mxu0 %v88_v25  ;;  %796 = vmatmul.mubr.f32.gmra.mxu1 %v90_v26  ;;  %v332_v12 = vld [vmem:[#allocation5 + $0x320] sm:$0xff]  ;;  %v299_v13 = vld [vmem:[#allocation5 + $0x218] sm:$0xff]  ;;  %v314_v15 = vld [vmem:[#allocation5 + $0x290] sm:$0xff] }
  0x4d   :  { %2022 = vmatprep.subr.mxu0 %v323_v27  ;;  %2077 = vmatpush3.msra.mxu1 %v340_v28  ;;  %v347_v14 = vld [vmem:[#allocation5 + $0x398] sm:$0xff]  ;;  %v209_v17 = vld [vmem:[#allocation2 + $0x548] sm:$0xff]  ;;  %v298_v19 = vld [vmem:[#allocation5 + $0x210] sm:$0xff] }
  0x4e   :  { %2023 = vmatpush3.msra.mxu0 %v307_v29  ;;  %2078 = vmatprep.subr.mxu1 %v355_v30  ;;  %v331_v16 = vld [vmem:[#allocation5 + $0x318] sm:$0xff]  ;;  %v346_v20 = vld [vmem:[#allocation5 + $0x390] sm:$0xff]  ;;  %v208_v21 = vld [vmem:[#allocation2 + $0x540] sm:$0xff] }
  0x4f   :  { %2024 = vmatprep.subr.mxu0 %v322_v31  ;;  %2079 = vmatpush3.msra.mxu1 %v339_v32  ;;  %v211_v18 = vld [vmem:[#allocation2 + $0x558] sm:$0xff]  ;;  %v210_v22 = vld [vmem:[#allocation2 + $0x550] sm:$0xff]  ;;  %v313_v23 = vld [vmem:[#allocation5 + $0x288] sm:$0xff] }
  0x50   :  { %695 = vmatprep.mubr.f32.mxu0 %v113_v33  ;;  %800 = vmatprep.mubr.f32.mxu1 %v115_v34  ;;  %v330_v24 = vld [vmem:[#allocation5 + $0x310] sm:$0xff]  ;;  %v297_v25 = vld [vmem:[#allocation5 + $0x208] sm:$0xff]  ;;  %v312_v27 = vld [vmem:[#allocation5 + $0x280] sm:$0xff] }
  0x51   :  { %2025 = vmatpush3.msra.mxu0 %v306_v35  ;;  %2080 = vmatprep.subr.mxu1 %v354_v36  ;;  %v345_v26 = vld [vmem:[#allocation5 + $0x388] sm:$0xff]  ;;  %v296_v29 = vld [vmem:[#allocation5 + $0x200] sm:$0xff]  ;;  %v47_v34 = vld [vmem:[#allocation2 + $0x38] sm:$0xff] }
  0x52   :  { %696 = vmatmul.mubr.f32.gmra.mxu0 %v112_v37  ;;  %801 = vmatmul.mubr.f32.gmra.mxu1 %v114_v38  ;;  %v329_v28 = vld [vmem:[#allocation5 + $0x308] sm:$0xff]  ;;  %v344_v31 = vld [vmem:[#allocation5 + $0x380] sm:$0xff]  ;;  %v391_v35 = vld [vmem:[#allocation5 + $0x4f8] sm:$0xff] }
  0x53   :  { %2026 = vmatprep.subr.mxu0 %v321_v39  ;;  %2081 = vmatpush3.msra.mxu1 %v338_v40  ;;  %v45_v30 = vld [vmem:[#allocation2 + $0x28] sm:$0xff]  ;;  %v44_v32 = vld [vmem:[#allocation2 + $0x20] sm:$0xff]  ;;  %v46_v36 = vld [vmem:[#allocation2 + $0x30] sm:$0xff] }
  0x54   :  { %2027 = vmatpush3.msra.mxu0 %v305_v41  ;;  %2082 = vmatprep.subr.mxu1 %v353_v42  ;;  %v328_v33 = vld [vmem:[#allocation5 + $0x300] sm:$0xff]  ;;  %v375_v37 = vld [vmem:[#allocation5 + $0x478] sm:$0xff]  ;;  %v390_v39 = vld [vmem:[#allocation5 + $0x4f0] sm:$0xff] }
  0x55   :  { %2028 = vmatprep.subr.mxu0 %v320_v43  ;;  %2083 = vmatpush3.msra.mxu1 %v337_v44  ;;  %v423_v38 = vld [vmem:[#allocation5 + $0x5f8] sm:$0xff]  ;;  %v69_v41 = vld [vmem:[#allocation2 + $0xe8] sm:$0xff]  ;;  %v374_v42 = vld [vmem:[#allocation5 + $0x470] sm:$0xff] }
  0x56   :  { %700 = vmatprep.mubr.f32.mxu0 %v137_v45  ;;  %805 = vmatprep.mubr.f32.mxu1 %v139_v46  ;;  %v407_v40 = vld [vmem:[#allocation5 + $0x578] sm:$0xff]  ;;  %v422_v43 = vld [vmem:[#allocation5 + $0x5f0] sm:$0xff]  ;;  %v68_v44 = vld [vmem:[#allocation2 + $0xe0] sm:$0xff] }
  0x57   :  { %2029 = vmatpush3.msra.mxu0 %v304_v47  ;;  %2084 = vmatprep.subr.mxu1 %v352_v48  ;;  %v71_v45 = vld [vmem:[#allocation2 + $0xf8] sm:$0xff]  ;;  %v389_v46 = vld [vmem:[#allocation5 + $0x4e8] sm:$0xff]  ;;  %v406_v47 = vld [vmem:[#allocation5 + $0x570] sm:$0xff] }
  0x58   :  { %701 = vmatmul.mubr.f32.gmra.mxu0 %v136_v49  ;;  %806 = vmatmul.mubr.f32.gmra.mxu1 %v138_v50  ;;  %v70_v48 = vld [vmem:[#allocation2 + $0xf0] sm:$0xff]  ;;  %v373_v49 = vld [vmem:[#allocation5 + $0x468] sm:$0xff] }
  0x59   :  { %2030 = vmatprep.subr.mxu0 %v319_v51  ;;  %2085 = vmatpush3.msra.mxu1 %v336_v52  ;;  %v421_v50 = vld [vmem:[#allocation5 + $0x5e8] sm:$0xff]  ;;  %v388_v51 = vld [vmem:[#allocation5 + $0x4e0] sm:$0xff] }
  0x5a   :  { %2031 = vmatpush3.msra.mxu0 %v303_v53  ;;  %2086 = vmatprep.subr.mxu1 %v351_v54  ;;  %v405_v52 = vld [vmem:[#allocation5 + $0x568] sm:$0xff]  ;;  %v372_v54 = vld [vmem:[#allocation5 + $0x460] sm:$0xff] }
  0x5b   :  { %2032 = vmatprep.subr.mxu0 %v318_v55  ;;  %2087 = vmatpush3.msra.mxu1 %v335_v56  ;;  %v93_v53 = vld [vmem:[#allocation2 + $0x1a8] sm:$0xff]  ;;  %v420_v55 = vld [vmem:[#allocation5 + $0x5e0] sm:$0xff] }
  0x5c   :  { %705 = vmatprep.mubr.f32.mxu0 %v161_v57  ;;  %810 = vmatprep.mubr.f32.mxu1 %v163_v58  ;;  %v92_v56 = vld [vmem:[#allocation2 + $0x1a0] sm:$0xff]  ;;  %v95_v57 = vld [vmem:[#allocation2 + $0x1b8] sm:$0xff] }
  0x5d   :  { %2033 = vmatpush3.msra.mxu0 %v302_v59  ;;  %2088 = vmatprep.subr.mxu1 %v350_v60  ;;  %v387_v58 = vld [vmem:[#allocation5 + $0x4d8] sm:$0xff]  ;;  %v404_v59 = vld [vmem:[#allocation5 + $0x560] sm:$0xff]  ;;  %v94_v60 = vld [vmem:[#allocation2 + $0x1b0] sm:$0xff] }
  0x5e   :  { %706 = vmatmul.mubr.f32.gmra.mxu0 %v160_v61  ;;  %811 = vmatmul.mubr.f32.gmra.mxu1 %v162_v62  ;;  %v371_v61 = vld [vmem:[#allocation5 + $0x458] sm:$0xff] }
  0x5f   :  { %2034 = vmatprep.subr.mxu0 %v317_v63  ;;  %2089 = vmatpush3.msra.mxu1 %v334_v0  ;;  %v419_v62 = vld [vmem:[#allocation5 + $0x5d8] sm:$0xff]  ;;  %v386_v63 = vld [vmem:[#allocation5 + $0x4d0] sm:$0xff] }
  0x60   :  { %2035 = vmatpush3.msra.mxu0 %v301_v1  ;;  %2090 = vmatprep.subr.mxu1 %v349_v2  ;;  %v403_v0 = vld [vmem:[#allocation5 + $0x558] sm:$0xff]  ;;  %v117_v1 = vld [vmem:[#allocation2 + $0x268] sm:$0xff]  ;;  %v370_v2 = vld [vmem:[#allocation5 + $0x450] sm:$0xff] }
  0x61   :  { %2036 = vmatprep.subr.mxu0 %v316_v3  ;;  %2091 = vmatpush3.msra.mxu1 %v333_v4  ;;  %v418_v3 = vld [vmem:[#allocation5 + $0x5d0] sm:$0xff]  ;;  %v116_v4 = vld [vmem:[#allocation2 + $0x260] sm:$0xff] }
  0x62   :  { %710 = vmatprep.mubr.f32.mxu0 %v185_v5  ;;  %815 = vmatprep.mubr.f32.mxu1 %v187_v6  ;;  %v119_v5 = vld [vmem:[#allocation2 + $0x278] sm:$0xff]  ;;  %v385_v6 = vld [vmem:[#allocation5 + $0x4c8] sm:$0xff] }
  0x63   :  { %2037 = vmatpush3.msra.mxu0 %v300_v7  ;;  %2092 = vmatprep.subr.mxu1 %v348_v8  ;;  %v402_v7 = vld [vmem:[#allocation5 + $0x550] sm:$0xff] }
  0x64   :  { %711 = vmatmul.mubr.f32.gmra.mxu0 %v184_v9  ;;  %816 = vmatmul.mubr.f32.gmra.mxu1 %v186_v10  ;;  %v118_v8 = vld [vmem:[#allocation2 + $0x270] sm:$0xff]  ;;  %v369_v9 = vld [vmem:[#allocation5 + $0x448] sm:$0xff] }
  0x65   :  { %2038 = vmatprep.subr.mxu0 %v315_v11  ;;  %2093 = vmatpush3.msra.mxu1 %v332_v12  ;;  %v417_v10 = vld [vmem:[#allocation5 + $0x5c8] sm:$0xff]  ;;  %v384_v11 = vld [vmem:[#allocation5 + $0x4c0] sm:$0xff] }
  0x66   :  { %2039 = vmatpush3.msra.mxu0 %v299_v13  ;;  %2094 = vmatprep.subr.mxu1 %v347_v14  ;;  %v401_v12 = vld [vmem:[#allocation5 + $0x548] sm:$0xff]  ;;  %v368_v14 = vld [vmem:[#allocation5 + $0x440] sm:$0xff] }
  0x67   :  { %2040 = vmatprep.subr.mxu0 %v314_v15  ;;  %2095 = vmatpush3.msra.mxu1 %v331_v16  ;;  %v141_v13 = vld [vmem:[#allocation2 + $0x328] sm:$0xff]  ;;  %v416_v15 = vld [vmem:[#allocation5 + $0x5c0] sm:$0xff] }
  0x68   :  { %715 = vmatprep.mubr.f32.mxu0 %v209_v17  ;;  %820 = vmatprep.mubr.f32.mxu1 %v211_v18  ;;  %v140_v16 = vld [vmem:[#allocation2 + $0x320] sm:$0xff]  ;;  %v143_v17 = vld [vmem:[#allocation2 + $0x338] sm:$0xff] }
  0x69   :  { %2041 = vmatpush3.msra.mxu0 %v298_v19  ;;  %2096 = vmatprep.subr.mxu1 %v346_v20  ;;  %v383_v18 = vld [vmem:[#allocation5 + $0x4b8] sm:$0xff]  ;;  %v400_v19 = vld [vmem:[#allocation5 + $0x540] sm:$0xff]  ;;  %v142_v20 = vld [vmem:[#allocation2 + $0x330] sm:$0xff] }
  0x6a   :  { %716 = vmatmul.mubr.f32.gmra.mxu0 %v208_v21  ;;  %821 = vmatmul.mubr.f32.gmra.mxu1 %v210_v22  ;;  %v367_v21 = vld [vmem:[#allocation5 + $0x438] sm:$0xff] }
  0x6b   :  { %2042 = vmatprep.subr.mxu0 %v313_v23  ;;  %2097 = vmatpush3.msra.mxu1 %v330_v24  ;;  %v415_v22 = vld [vmem:[#allocation5 + $0x5b8] sm:$0xff]  ;;  %v382_v23 = vld [vmem:[#allocation5 + $0x4b0] sm:$0xff] }
  0x6c   :  { %2043 = vmatpush3.msra.mxu0 %v297_v25  ;;  %2098 = vmatprep.subr.mxu1 %v345_v26  ;;  %v399_v24 = vld [vmem:[#allocation5 + $0x538] sm:$0xff]  ;;  %v165_v25 = vld [vmem:[#allocation2 + $0x3e8] sm:$0xff]  ;;  %v366_v26 = vld [vmem:[#allocation5 + $0x430] sm:$0xff] }
  0x6d   :  { %2044 = vmatprep.subr.mxu0 %v312_v27  ;;  %2099 = vmatpush3.msra.mxu1 %v329_v28  ;;  %v414_v27 = vld [vmem:[#allocation5 + $0x5b0] sm:$0xff]  ;;  %v164_v28 = vld [vmem:[#allocation2 + $0x3e0] sm:$0xff] }
  0x6e   :  { %2045 = vmatpush3.msra.mxu0 %v296_v29  ;;  %890 = vmatprep.mubr.f32.mxu0 %v45_v30  ;;  %v167_v29 = vld [vmem:[#allocation2 + $0x3f8] sm:$0xff]  ;;  %v381_v30 = vld [vmem:[#allocation5 + $0x4a8] sm:$0xff] }
  0x6f   :  { %2100 = vmatprep.subr.mxu1 %v344_v31  ;;  %891 = vmatmul.mubr.f32.vlgmr.msra.gmra.mxu0 %v44_v32  ;;  %v398_v31 = vld [vmem:[#allocation5 + $0x530] sm:$0xff] }
  0x70   :  { %2101 = vmatpush3.msra.mxu1 %v328_v33  ;;  %995 = vmatprep.mubr.f32.mxu1 %v47_v34  ;;  %v166_v32 = vld [vmem:[#allocation2 + $0x3f0] sm:$0xff]  ;;  %v365_v33 = vld [vmem:[#allocation5 + $0x428] sm:$0xff] }
  0x71   :  { %2126 = vmatprep.subr.mxu0 %v391_v35  ;;  %996 = vmatmul.mubr.f32.vlgmr.msra.gmra.mxu1 %v46_v36  ;;  %v413_v34 = vld [vmem:[#allocation5 + $0x5a8] sm:$0xff]  ;;  %v380_v35 = vld [vmem:[#allocation5 + $0x4a0] sm:$0xff] }
  0x72   :  { %2127 = vmatpush3.msra.mxu0 %v375_v37  ;;  %2182 = vmatprep.subr.mxu1 %v423_v38  ;;  %v397_v36 = vld [vmem:[#allocation5 + $0x528] sm:$0xff]  ;;  %v364_v38 = vld [vmem:[#allocation5 + $0x420] sm:$0xff] }
  0x73   :  { %2128 = vmatprep.subr.mxu0 %v390_v39  ;;  %2183 = vmatpush3.msra.mxu1 %v407_v40  ;;  %v189_v37 = vld [vmem:[#allocation2 + $0x4a8] sm:$0xff]  ;;  %v412_v39 = vld [vmem:[#allocation5 + $0x5a0] sm:$0xff] }
  0x74   :  { %895 = vmatprep.mubr.f32.mxu0 %v69_v41  ;;  %2129 = vmatpush3.msra.mxu0 %v374_v42  ;;  %v188_v40 = vld [vmem:[#allocation2 + $0x4a0] sm:$0xff]  ;;  %v191_v41 = vld [vmem:[#allocation2 + $0x4b8] sm:$0xff] }
  0x75   :  { %2184 = vmatprep.subr.mxu1 %v422_v43  ;;  %896 = vmatmul.mubr.f32.gmra.mxu0 %v68_v44  ;;  %v379_v42 = vld [vmem:[#allocation5 + $0x498] sm:$0xff]  ;;  %v396_v43 = vld [vmem:[#allocation5 + $0x520] sm:$0xff]  ;;  %v190_v44 = vld [vmem:[#allocation2 + $0x4b0] sm:$0xff] }
  0x76   :  { %1000 = vmatprep.mubr.f32.mxu1 %v71_v45  ;;  %2130 = vmatprep.subr.mxu0 %v389_v46  ;;  %v363_v45 = vld [vmem:[#allocation5 + $0x418] sm:$0xff] }
  0x77   :  { %2185 = vmatpush3.msra.mxu1 %v406_v47  ;;  %2131 = vmatpush3.msra.mxu0 %v373_v49  ;;  %v411_v46 = vld [vmem:[#allocation5 + $0x598] sm:$0xff]  ;;  %v378_v47 = vld [vmem:[#allocation5 + $0x490] sm:$0xff]  ;;  %v213_v49 = vld [vmem:[#allocation2 + $0x568] sm:$0xff] }
  0x78   :  { %1001 = vmatmul.mubr.f32.gmra.mxu1 %v70_v48  ;;  %2186 = vmatprep.subr.mxu1 %v421_v50  ;;  %v395_v48 = vld [vmem:[#allocation5 + $0x518] sm:$0xff]  ;;  %v362_v50 = vld [vmem:[#allocation5 + $0x410] sm:$0xff] }
  0x79   :  { %2132 = vmatprep.subr.mxu0 %v388_v51  ;;  %2187 = vmatpush3.msra.mxu1 %v405_v52  ;;  %v410_v51 = vld [vmem:[#allocation5 + $0x590] sm:$0xff]  ;;  %v212_v52 = vld [vmem:[#allocation2 + $0x560] sm:$0xff] }
  0x7a   :  { %900 = vmatprep.mubr.f32.mxu0 %v93_v53  ;;  %2133 = vmatpush3.msra.mxu0 %v372_v54  ;;  %v215_v53 = vld [vmem:[#allocation2 + $0x578] sm:$0xff]  ;;  %v377_v54 = vld [vmem:[#allocation5 + $0x488] sm:$0xff] }
  0x7b   :  { %2188 = vmatprep.subr.mxu1 %v420_v55  ;;  %901 = vmatmul.mubr.f32.gmra.mxu0 %v92_v56  ;;  %v394_v55 = vld [vmem:[#allocation5 + $0x510] sm:$0xff] }
  0x7c   :  { %1005 = vmatprep.mubr.f32.mxu1 %v95_v57  ;;  %2134 = vmatprep.subr.mxu0 %v387_v58  ;;  %v214_v56 = vld [vmem:[#allocation2 + $0x570] sm:$0xff]  ;;  %v361_v57 = vld [vmem:[#allocation5 + $0x408] sm:$0xff] }
  0x7d   :  { %2189 = vmatpush3.msra.mxu1 %v404_v59  ;;  %2135 = vmatpush3.msra.mxu0 %v371_v61  ;;  %v409_v58 = vld [vmem:[#allocation5 + $0x588] sm:$0xff]  ;;  %v376_v59 = vld [vmem:[#allocation5 + $0x480] sm:$0xff] }
  0x7e   :  { %1006 = vmatmul.mubr.f32.gmra.mxu1 %v94_v60  ;;  %2190 = vmatprep.subr.mxu1 %v419_v62  ;;  %v393_v60 = vld [vmem:[#allocation5 + $0x508] sm:$0xff]  ;;  %v360_v61 = vld [vmem:[#allocation5 + $0x400] sm:$0xff] }
  0x7f   :  { %2136 = vmatprep.subr.mxu0 %v386_v63  ;;  %2191 = vmatpush3.msra.mxu1 %v403_v0  ;;  %v49_v62 = vld [vmem:[#allocation2 + $0x48] sm:$0xff]  ;;  %v408_v63 = vld [vmem:[#allocation5 + $0x580] sm:$0xff] }
  0x80   :  { %905 = vmatprep.mubr.f32.mxu0 %v117_v1  ;;  %2137 = vmatpush3.msra.mxu0 %v370_v2  ;;  %v48_v0 = vld [vmem:[#allocation2 + $0x40] sm:$0xff]  ;;  %v51_v2 = vld [vmem:[#allocation2 + $0x58] sm:$0xff] }
  0x81   :  { %2192 = vmatprep.subr.mxu1 %v418_v3  ;;  %906 = vmatmul.mubr.f32.gmra.mxu0 %v116_v4  ;;  %v392_v1 = vld [vmem:[#allocation5 + $0x500] sm:$0xff]  ;;  %v455_v3 = vld [vmem:[#allocation5 + $0x6f8] sm:$0xff]  ;;  %v50_v4 = vld [vmem:[#allocation2 + $0x50] sm:$0xff] }
  0x82   :  { %1010 = vmatprep.mubr.f32.mxu1 %v119_v5  ;;  %2138 = vmatprep.subr.mxu0 %v385_v6  ;;  %v439_v5 = vld [vmem:[#allocation5 + $0x678] sm:$0xff] }
  0x83   :  { %2193 = vmatpush3.msra.mxu1 %v402_v7  ;;  %2139 = vmatpush3.msra.mxu0 %v369_v9  ;;  %v487_v6 = vld [vmem:[#allocation5 + $0x7f8] sm:$0xff]  ;;  %v454_v7 = vld [vmem:[#allocation5 + $0x6f0] sm:$0xff]  ;;  %v73_v9 = vld [vmem:[#allocation2 + $0x108] sm:$0xff] }
  0x84   :  { %1011 = vmatmul.mubr.f32.gmra.mxu1 %v118_v8  ;;  %2194 = vmatprep.subr.mxu1 %v417_v10  ;;  %v471_v8 = vld [vmem:[#allocation5 + $0x778] sm:$0xff]  ;;  %v438_v10 = vld [vmem:[#allocation5 + $0x670] sm:$0xff] }
  0x85   :  { %2140 = vmatprep.subr.mxu0 %v384_v11  ;;  %2195 = vmatpush3.msra.mxu1 %v401_v12  ;;  %v486_v11 = vld [vmem:[#allocation5 + $0x7f0] sm:$0xff]  ;;  %v72_v12 = vld [vmem:[#allocation2 + $0x100] sm:$0xff] }
  0x86   :  { %910 = vmatprep.mubr.f32.mxu0 %v141_v13  ;;  %2141 = vmatpush3.msra.mxu0 %v368_v14  ;;  %v75_v13 = vld [vmem:[#allocation2 + $0x118] sm:$0xff]  ;;  %v453_v14 = vld [vmem:[#allocation5 + $0x6e8] sm:$0xff] }
  0x87   :  { %2196 = vmatprep.subr.mxu1 %v416_v15  ;;  %911 = vmatmul.mubr.f32.gmra.mxu0 %v140_v16  ;;  %v470_v15 = vld [vmem:[#allocation5 + $0x770] sm:$0xff] }
  0x88   :  { %1015 = vmatprep.mubr.f32.mxu1 %v143_v17  ;;  %2142 = vmatprep.subr.mxu0 %v383_v18  ;;  %v74_v16 = vld [vmem:[#allocation2 + $0x110] sm:$0xff]  ;;  %v437_v17 = vld [vmem:[#allocation5 + $0x668] sm:$0xff] }
  0x89   :  { %2197 = vmatpush3.msra.mxu1 %v400_v19  ;;  %2143 = vmatpush3.msra.mxu0 %v367_v21  ;;  %v485_v18 = vld [vmem:[#allocation5 + $0x7e8] sm:$0xff]  ;;  %v452_v19 = vld [vmem:[#allocation5 + $0x6e0] sm:$0xff] }
  0x8a   :  { %1016 = vmatmul.mubr.f32.gmra.mxu1 %v142_v20  ;;  %2198 = vmatprep.subr.mxu1 %v415_v22  ;;  %v469_v20 = vld [vmem:[#allocation5 + $0x768] sm:$0xff]  ;;  %v436_v22 = vld [vmem:[#allocation5 + $0x660] sm:$0xff] }
  0x8b   :  { %2144 = vmatprep.subr.mxu0 %v382_v23  ;;  %2199 = vmatpush3.msra.mxu1 %v399_v24  ;;  %v97_v21 = vld [vmem:[#allocation2 + $0x1c8] sm:$0xff]  ;;  %v484_v23 = vld [vmem:[#allocation5 + $0x7e0] sm:$0xff] }
  0x8c   :  { %915 = vmatprep.mubr.f32.mxu0 %v165_v25  ;;  %2145 = vmatpush3.msra.mxu0 %v366_v26  ;;  %v96_v24 = vld [vmem:[#allocation2 + $0x1c0] sm:$0xff]  ;;  %v99_v25 = vld [vmem:[#allocation2 + $0x1d8] sm:$0xff] }
  0x8d   :  { %2200 = vmatprep.subr.mxu1 %v414_v27  ;;  %916 = vmatmul.mubr.f32.gmra.mxu0 %v164_v28  ;;  %v451_v26 = vld [vmem:[#allocation5 + $0x6d8] sm:$0xff]  ;;  %v468_v27 = vld [vmem:[#allocation5 + $0x760] sm:$0xff]  ;;  %v98_v28 = vld [vmem:[#allocation2 + $0x1d0] sm:$0xff] }
  0x8e   :  { %1020 = vmatprep.mubr.f32.mxu1 %v167_v29  ;;  %2146 = vmatprep.subr.mxu0 %v381_v30  ;;  %v435_v29 = vld [vmem:[#allocation5 + $0x658] sm:$0xff] }
  0x8f   :  { %2201 = vmatpush3.msra.mxu1 %v398_v31  ;;  %2147 = vmatpush3.msra.mxu0 %v365_v33  ;;  %v483_v30 = vld [vmem:[#allocation5 + $0x7d8] sm:$0xff]  ;;  %v450_v31 = vld [vmem:[#allocation5 + $0x6d0] sm:$0xff]  ;;  %v121_v33 = vld [vmem:[#allocation2 + $0x288] sm:$0xff] }
  0x90   :  { %1021 = vmatmul.mubr.f32.gmra.mxu1 %v166_v32  ;;  %2202 = vmatprep.subr.mxu1 %v413_v34  ;;  %v467_v32 = vld [vmem:[#allocation5 + $0x758] sm:$0xff]  ;;  %v434_v34 = vld [vmem:[#allocation5 + $0x650] sm:$0xff] }
  0x91   :  { %2148 = vmatprep.subr.mxu0 %v380_v35  ;;  %2203 = vmatpush3.msra.mxu1 %v397_v36  ;;  %v482_v35 = vld [vmem:[#allocation5 + $0x7d0] sm:$0xff]  ;;  %v120_v36 = vld [vmem:[#allocation2 + $0x280] sm:$0xff] }
  0x92   :  { %920 = vmatprep.mubr.f32.mxu0 %v189_v37  ;;  %2149 = vmatpush3.msra.mxu0 %v364_v38  ;;  %v123_v37 = vld [vmem:[#allocation2 + $0x298] sm:$0xff]  ;;  %v449_v38 = vld [vmem:[#allocation5 + $0x6c8] sm:$0xff] }
  0x93   :  { %2204 = vmatprep.subr.mxu1 %v412_v39  ;;  %921 = vmatmul.mubr.f32.gmra.mxu0 %v188_v40  ;;  %v466_v39 = vld [vmem:[#allocation5 + $0x750] sm:$0xff] }
  0x94   :  { %1025 = vmatprep.mubr.f32.mxu1 %v191_v41  ;;  %2150 = vmatprep.subr.mxu0 %v379_v42  ;;  %v122_v40 = vld [vmem:[#allocation2 + $0x290] sm:$0xff]  ;;  %v433_v41 = vld [vmem:[#allocation5 + $0x648] sm:$0xff] }
  0x95   :  { %2205 = vmatpush3.msra.mxu1 %v396_v43  ;;  %2151 = vmatpush3.msra.mxu0 %v363_v45  ;;  %v481_v42 = vld [vmem:[#allocation5 + $0x7c8] sm:$0xff]  ;;  %v448_v43 = vld [vmem:[#allocation5 + $0x6c0] sm:$0xff] }
  0x96   :  { %1026 = vmatmul.mubr.f32.gmra.mxu1 %v190_v44  ;;  %2206 = vmatprep.subr.mxu1 %v411_v46  ;;  %v465_v44 = vld [vmem:[#allocation5 + $0x748] sm:$0xff]  ;;  %v432_v46 = vld [vmem:[#allocation5 + $0x640] sm:$0xff] }
  0x97   :  { %2152 = vmatprep.subr.mxu0 %v378_v47  ;;  %2207 = vmatpush3.msra.mxu1 %v395_v48  ;;  %v145_v45 = vld [vmem:[#allocation2 + $0x348] sm:$0xff]  ;;  %v480_v47 = vld [vmem:[#allocation5 + $0x7c0] sm:$0xff] }
  0x98   :  { %925 = vmatprep.mubr.f32.mxu0 %v213_v49  ;;  %2153 = vmatpush3.msra.mxu0 %v362_v50  ;;  %v144_v48 = vld [vmem:[#allocation2 + $0x340] sm:$0xff]  ;;  %v147_v49 = vld [vmem:[#allocation2 + $0x358] sm:$0xff] }
  0x99   :  { %2208 = vmatprep.subr.mxu1 %v410_v51  ;;  %926 = vmatmul.mubr.f32.gmra.mxu0 %v212_v52  ;;  %v447_v50 = vld [vmem:[#allocation5 + $0x6b8] sm:$0xff]  ;;  %v464_v51 = vld [vmem:[#allocation5 + $0x740] sm:$0xff]  ;;  %v146_v52 = vld [vmem:[#allocation2 + $0x350] sm:$0xff] }
  0x9a   :  { %1030 = vmatprep.mubr.f32.mxu1 %v215_v53  ;;  %2154 = vmatprep.subr.mxu0 %v377_v54  ;;  %v431_v53 = vld [vmem:[#allocation5 + $0x638] sm:$0xff] }
  0x9b   :  { %2209 = vmatpush3.msra.mxu1 %v394_v55  ;;  %2155 = vmatpush3.msra.mxu0 %v361_v57  ;;  %v479_v54 = vld [vmem:[#allocation5 + $0x7b8] sm:$0xff]  ;;  %v446_v55 = vld [vmem:[#allocation5 + $0x6b0] sm:$0xff]  ;;  %v169_v57 = vld [vmem:[#allocation2 + $0x408] sm:$0xff] }
  0x9c   :  { %1031 = vmatmul.mubr.f32.gmra.mxu1 %v214_v56  ;;  %2210 = vmatprep.subr.mxu1 %v409_v58  ;;  %v463_v56 = vld [vmem:[#allocation5 + $0x738] sm:$0xff]  ;;  %v430_v58 = vld [vmem:[#allocation5 + $0x630] sm:$0xff] }
  0x9d   :  { %2156 = vmatprep.subr.mxu0 %v376_v59  ;;  %2211 = vmatpush3.msra.mxu1 %v393_v60  ;;  %v478_v59 = vld [vmem:[#allocation5 + $0x7b0] sm:$0xff]  ;;  %v168_v60 = vld [vmem:[#allocation2 + $0x400] sm:$0xff] }
  0x9e   :  { %2157 = vmatpush3.msra.mxu0 %v360_v61  ;;  %1100 = vmatprep.mubr.f32.mxu0 %v49_v62  ;;  %v171_v61 = vld [vmem:[#allocation2 + $0x418] sm:$0xff]  ;;  %v445_v62 = vld [vmem:[#allocation5 + $0x6a8] sm:$0xff] }
  0x9f   :  { %2212 = vmatprep.subr.mxu1 %v408_v63  ;;  %1101 = vmatmul.mubr.f32.vlgmr.msra.gmra.mxu0 %v48_v0  ;;  %v462_v63 = vld [vmem:[#allocation5 + $0x730] sm:$0xff] }
  0xa0   :  { %2213 = vmatpush3.msra.mxu1 %v392_v1  ;;  %1205 = vmatprep.mubr.f32.mxu1 %v51_v2  ;;  %v170_v0 = vld [vmem:[#allocation2 + $0x410] sm:$0xff]  ;;  %v429_v1 = vld [vmem:[#allocation5 + $0x628] sm:$0xff] }
  0xa1   :  { %2238 = vmatprep.subr.mxu0 %v455_v3  ;;  %1206 = vmatmul.mubr.f32.vlgmr.msra.gmra.mxu1 %v50_v4  ;;  %v477_v2 = vld [vmem:[#allocation5 + $0x7a8] sm:$0xff]  ;;  %v444_v3 = vld [vmem:[#allocation5 + $0x6a0] sm:$0xff] }
  0xa2   :  { %2239 = vmatpush3.msra.mxu0 %v439_v5  ;;  %2294 = vmatprep.subr.mxu1 %v487_v6  ;;  %v461_v4 = vld [vmem:[#allocation5 + $0x728] sm:$0xff]  ;;  %v428_v6 = vld [vmem:[#allocation5 + $0x620] sm:$0xff] }
  0xa3   :  { %2240 = vmatprep.subr.mxu0 %v454_v7  ;;  %2295 = vmatpush3.msra.mxu1 %v471_v8  ;;  %v193_v5 = vld [vmem:[#allocation2 + $0x4c8] sm:$0xff]  ;;  %v476_v7 = vld [vmem:[#allocation5 + $0x7a0] sm:$0xff] }
  0xa4   :  { %1105 = vmatprep.mubr.f32.mxu0 %v73_v9  ;;  %2241 = vmatpush3.msra.mxu0 %v438_v10  ;;  %v192_v8 = vld [vmem:[#allocation2 + $0x4c0] sm:$0xff]  ;;  %v195_v9 = vld [vmem:[#allocation2 + $0x4d8] sm:$0xff] }
  0xa5   :  { %2296 = vmatprep.subr.mxu1 %v486_v11  ;;  %1106 = vmatmul.mubr.f32.gmra.mxu0 %v72_v12  ;;  %v443_v10 = vld [vmem:[#allocation5 + $0x698] sm:$0xff]  ;;  %v460_v11 = vld [vmem:[#allocation5 + $0x720] sm:$0xff]  ;;  %v194_v12 = vld [vmem:[#allocation2 + $0x4d0] sm:$0xff] }
  0xa6   :  { %1210 = vmatprep.mubr.f32.mxu1 %v75_v13  ;;  %2242 = vmatprep.subr.mxu0 %v453_v14  ;;  %v427_v13 = vld [vmem:[#allocation5 + $0x618] sm:$0xff] }
  0xa7   :  { %2297 = vmatpush3.msra.mxu1 %v470_v15  ;;  %2243 = vmatpush3.msra.mxu0 %v437_v17  ;;  %v475_v14 = vld [vmem:[#allocation5 + $0x798] sm:$0xff]  ;;  %v442_v15 = vld [vmem:[#allocation5 + $0x690] sm:$0xff]  ;;  %v217_v17 = vld [vmem:[#allocation2 + $0x588] sm:$0xff] }
  0xa8   :  { %1211 = vmatmul.mubr.f32.gmra.mxu1 %v74_v16  ;;  %2298 = vmatprep.subr.mxu1 %v485_v18  ;;  %v459_v16 = vld [vmem:[#allocation5 + $0x718] sm:$0xff]  ;;  %v426_v18 = vld [vmem:[#allocation5 + $0x610] sm:$0xff] }
  0xa9   :  { %2244 = vmatprep.subr.mxu0 %v452_v19  ;;  %2299 = vmatpush3.msra.mxu1 %v469_v20  ;;  %v474_v19 = vld [vmem:[#allocation5 + $0x790] sm:$0xff]  ;;  %v216_v20 = vld [vmem:[#allocation2 + $0x580] sm:$0xff] }
  0xaa   :  { %1110 = vmatprep.mubr.f32.mxu0 %v97_v21  ;;  %2245 = vmatpush3.msra.mxu0 %v436_v22  ;;  %v219_v21 = vld [vmem:[#allocation2 + $0x598] sm:$0xff]  ;;  %v441_v22 = vld [vmem:[#allocation5 + $0x688] sm:$0xff] }
  0xab   :  { %2300 = vmatprep.subr.mxu1 %v484_v23  ;;  %1111 = vmatmul.mubr.f32.gmra.mxu0 %v96_v24  ;;  %v458_v23 = vld [vmem:[#allocation5 + $0x710] sm:$0xff] }
  0xac   :  { %1215 = vmatprep.mubr.f32.mxu1 %v99_v25  ;;  %2246 = vmatprep.subr.mxu0 %v451_v26  ;;  %v218_v24 = vld [vmem:[#allocation2 + $0x590] sm:$0xff]  ;;  %v425_v25 = vld [vmem:[#allocation5 + $0x608] sm:$0xff] }
  0xad   :  { %2301 = vmatpush3.msra.mxu1 %v468_v27  ;;  %2247 = vmatpush3.msra.mxu0 %v435_v29  ;;  %v473_v26 = vld [vmem:[#allocation5 + $0x788] sm:$0xff]  ;;  %v440_v27 = vld [vmem:[#allocation5 + $0x680] sm:$0xff] }
  0xae   :  { %1216 = vmatmul.mubr.f32.gmra.mxu1 %v98_v28  ;;  %2302 = vmatprep.subr.mxu1 %v483_v30  ;;  %v457_v28 = vld [vmem:[#allocation5 + $0x708] sm:$0xff]  ;;  %v424_v29 = vld [vmem:[#allocation5 + $0x600] sm:$0xff] }
  0xaf   :  { %2248 = vmatprep.subr.mxu0 %v450_v31  ;;  %2303 = vmatpush3.msra.mxu1 %v467_v32  ;;  %v53_v30 = vld [vmem:[#allocation2 + $0x68] sm:$0xff]  ;;  %v472_v31 = vld [vmem:[#allocation5 + $0x780] sm:$0xff] }
  0xb0   :  { %1115 = vmatprep.mubr.f32.mxu0 %v121_v33  ;;  %2249 = vmatpush3.msra.mxu0 %v434_v34  ;;  %v52_v32 = vld [vmem:[#allocation2 + $0x60] sm:$0xff]  ;;  %v55_v34 = vld [vmem:[#allocation2 + $0x78] sm:$0xff] }
  0xb1   :  { %2304 = vmatprep.subr.mxu1 %v482_v35  ;;  %1116 = vmatmul.mubr.f32.gmra.mxu0 %v120_v36  ;;  %v456_v33 = vld [vmem:[#allocation5 + $0x700] sm:$0xff]  ;;  %v519_v35 = vld [vmem:[#allocation5 + $0x8f8] sm:$0xff]  ;;  %v54_v36 = vld [vmem:[#allocation2 + $0x70] sm:$0xff] }
  0xb2   :  { %1220 = vmatprep.mubr.f32.mxu1 %v123_v37  ;;  %2250 = vmatprep.subr.mxu0 %v449_v38  ;;  %v503_v37 = vld [vmem:[#allocation5 + $0x878] sm:$0xff] }
  0xb3   :  { %2305 = vmatpush3.msra.mxu1 %v466_v39  ;;  %2251 = vmatpush3.msra.mxu0 %v433_v41  ;;  %v551_v38 = vld [vmem:[#allocation5 + $0x9f8] sm:$0xff]  ;;  %v518_v39 = vld [vmem:[#allocation5 + $0x8f0] sm:$0xff]  ;;  %v77_v41 = vld [vmem:[#allocation2 + $0x128] sm:$0xff] }
  0xb4   :  { %1221 = vmatmul.mubr.f32.gmra.mxu1 %v122_v40  ;;  %2306 = vmatprep.subr.mxu1 %v481_v42  ;;  %v535_v40 = vld [vmem:[#allocation5 + $0x978] sm:$0xff]  ;;  %v502_v42 = vld [vmem:[#allocation5 + $0x870] sm:$0xff] }
  0xb5   :  { %2252 = vmatprep.subr.mxu0 %v448_v43  ;;  %2307 = vmatpush3.msra.mxu1 %v465_v44  ;;  %v550_v43 = vld [vmem:[#allocation5 + $0x9f0] sm:$0xff]  ;;  %v76_v44 = vld [vmem:[#allocation2 + $0x120] sm:$0xff] }
  0xb6   :  { %1120 = vmatprep.mubr.f32.mxu0 %v145_v45  ;;  %2253 = vmatpush3.msra.mxu0 %v432_v46  ;;  %v79_v45 = vld [vmem:[#allocation2 + $0x138] sm:$0xff]  ;;  %v517_v46 = vld [vmem:[#allocation5 + $0x8e8] sm:$0xff] }
  0xb7   :  { %2308 = vmatprep.subr.mxu1 %v480_v47  ;;  %1121 = vmatmul.mubr.f32.gmra.mxu0 %v144_v48  ;;  %v534_v47 = vld [vmem:[#allocation5 + $0x970] sm:$0xff] }
  0xb8   :  { %1225 = vmatprep.mubr.f32.mxu1 %v147_v49  ;;  %2254 = vmatprep.subr.mxu0 %v447_v50  ;;  %v78_v48 = vld [vmem:[#allocation2 + $0x130] sm:$0xff]  ;;  %v501_v49 = vld [vmem:[#allocation5 + $0x868] sm:$0xff] }
  0xb9   :  { %2309 = vmatpush3.msra.mxu1 %v464_v51  ;;  %2255 = vmatpush3.msra.mxu0 %v431_v53  ;;  %v549_v50 = vld [vmem:[#allocation5 + $0x9e8] sm:$0xff]  ;;  %v516_v51 = vld [vmem:[#allocation5 + $0x8e0] sm:$0xff] }
  0xba   :  { %1226 = vmatmul.mubr.f32.gmra.mxu1 %v146_v52  ;;  %2310 = vmatprep.subr.mxu1 %v479_v54  ;;  %v533_v52 = vld [vmem:[#allocation5 + $0x968] sm:$0xff]  ;;  %v500_v54 = vld [vmem:[#allocation5 + $0x860] sm:$0xff] }
  0xbb   :  { %2256 = vmatprep.subr.mxu0 %v446_v55  ;;  %2311 = vmatpush3.msra.mxu1 %v463_v56  ;;  %v101_v53 = vld [vmem:[#allocation2 + $0x1e8] sm:$0xff]  ;;  %v548_v55 = vld [vmem:[#allocation5 + $0x9e0] sm:$0xff] }
  0xbc   :  { %1125 = vmatprep.mubr.f32.mxu0 %v169_v57  ;;  %2257 = vmatpush3.msra.mxu0 %v430_v58  ;;  %v100_v56 = vld [vmem:[#allocation2 + $0x1e0] sm:$0xff]  ;;  %v103_v57 = vld [vmem:[#allocation2 + $0x1f8] sm:$0xff] }
  0xbd   :  { %2312 = vmatprep.subr.mxu1 %v478_v59  ;;  %1126 = vmatmul.mubr.f32.gmra.mxu0 %v168_v60  ;;  %v515_v58 = vld [vmem:[#allocation5 + $0x8d8] sm:$0xff]  ;;  %v532_v59 = vld [vmem:[#allocation5 + $0x960] sm:$0xff]  ;;  %v102_v60 = vld [vmem:[#allocation2 + $0x1f0] sm:$0xff] }
  0xbe   :  { %1230 = vmatprep.mubr.f32.mxu1 %v171_v61  ;;  %2258 = vmatprep.subr.mxu0 %v445_v62  ;;  %v499_v61 = vld [vmem:[#allocation5 + $0x858] sm:$0xff] }
  0xbf   :  { %2313 = vmatpush3.msra.mxu1 %v462_v63  ;;  %2259 = vmatpush3.msra.mxu0 %v429_v1  ;;  %v547_v62 = vld [vmem:[#allocation5 + $0x9d8] sm:$0xff]  ;;  %v514_v63 = vld [vmem:[#allocation5 + $0x8d0] sm:$0xff]  ;;  %v125_v1 = vld [vmem:[#allocation2 + $0x2a8] sm:$0xff] }
  0xc0   :  { %1231 = vmatmul.mubr.f32.gmra.mxu1 %v170_v0  ;;  %2314 = vmatprep.subr.mxu1 %v477_v2  ;;  %v531_v0 = vld [vmem:[#allocation5 + $0x958] sm:$0xff]  ;;  %v498_v2 = vld [vmem:[#allocation5 + $0x850] sm:$0xff] }
  0xc1   :  { %2260 = vmatprep.subr.mxu0 %v444_v3  ;;  %2315 = vmatpush3.msra.mxu1 %v461_v4  ;;  %v546_v3 = vld [vmem:[#allocation5 + $0x9d0] sm:$0xff]  ;;  %v124_v4 = vld [vmem:[#allocation2 + $0x2a0] sm:$0xff] }
  0xc2   :  { %1130 = vmatprep.mubr.f32.mxu0 %v193_v5  ;;  %2261 = vmatpush3.msra.mxu0 %v428_v6  ;;  %v127_v5 = vld [vmem:[#allocation2 + $0x2b8] sm:$0xff]  ;;  %v513_v6 = vld [vmem:[#allocation5 + $0x8c8] sm:$0xff] }
  0xc3   :  { %2316 = vmatprep.subr.mxu1 %v476_v7  ;;  %1131 = vmatmul.mubr.f32.gmra.mxu0 %v192_v8  ;;  %v530_v7 = vld [vmem:[#allocation5 + $0x950] sm:$0xff] }
  0xc4   :  { %1235 = vmatprep.mubr.f32.mxu1 %v195_v9  ;;  %2262 = vmatprep.subr.mxu0 %v443_v10  ;;  %v126_v8 = vld [vmem:[#allocation2 + $0x2b0] sm:$0xff]  ;;  %v497_v9 = vld [vmem:[#allocation5 + $0x848] sm:$0xff] }
  0xc5   :  { %2317 = vmatpush3.msra.mxu1 %v460_v11  ;;  %2263 = vmatpush3.msra.mxu0 %v427_v13  ;;  %v545_v10 = vld [vmem:[#allocation5 + $0x9c8] sm:$0xff]  ;;  %v512_v11 = vld [vmem:[#allocation5 + $0x8c0] sm:$0xff] }
  0xc6   :  { %1236 = vmatmul.mubr.f32.gmra.mxu1 %v194_v12  ;;  %2318 = vmatprep.subr.mxu1 %v475_v14  ;;  %v529_v12 = vld [vmem:[#allocation5 + $0x948] sm:$0xff]  ;;  %v496_v14 = vld [vmem:[#allocation5 + $0x840] sm:$0xff] }
  0xc7   :  { %2264 = vmatprep.subr.mxu0 %v442_v15  ;;  %2319 = vmatpush3.msra.mxu1 %v459_v16  ;;  %v149_v13 = vld [vmem:[#allocation2 + $0x368] sm:$0xff]  ;;  %v544_v15 = vld [vmem:[#allocation5 + $0x9c0] sm:$0xff] }
  0xc8   :  { %1135 = vmatprep.mubr.f32.mxu0 %v217_v17  ;;  %2265 = vmatpush3.msra.mxu0 %v426_v18  ;;  %v148_v16 = vld [vmem:[#allocation2 + $0x360] sm:$0xff]  ;;  %v151_v17 = vld [vmem:[#allocation2 + $0x378] sm:$0xff] }
  0xc9   :  { %2320 = vmatprep.subr.mxu1 %v474_v19  ;;  %1136 = vmatmul.mubr.f32.gmra.mxu0 %v216_v20  ;;  %v511_v18 = vld [vmem:[#allocation5 + $0x8b8] sm:$0xff]  ;;  %v528_v19 = vld [vmem:[#allocation5 + $0x940] sm:$0xff]  ;;  %v150_v20 = vld [vmem:[#allocation2 + $0x370] sm:$0xff] }
  0xca   :  { %1240 = vmatprep.mubr.f32.mxu1 %v219_v21  ;;  %2266 = vmatprep.subr.mxu0 %v441_v22  ;;  %v495_v21 = vld [vmem:[#allocation5 + $0x838] sm:$0xff] }
  0xcb   :  { %2321 = vmatpush3.msra.mxu1 %v458_v23  ;;  %2267 = vmatpush3.msra.mxu0 %v425_v25  ;;  %v543_v22 = vld [vmem:[#allocation5 + $0x9b8] sm:$0xff]  ;;  %v510_v23 = vld [vmem:[#allocation5 + $0x8b0] sm:$0xff]  ;;  %v173_v25 = vld [vmem:[#allocation2 + $0x428] sm:$0xff] }
  0xcc   :  { %1241 = vmatmul.mubr.f32.gmra.mxu1 %v218_v24  ;;  %2322 = vmatprep.subr.mxu1 %v473_v26  ;;  %v527_v24 = vld [vmem:[#allocation5 + $0x938] sm:$0xff]  ;;  %v494_v26 = vld [vmem:[#allocation5 + $0x830] sm:$0xff] }
  0xcd   :  { %2268 = vmatprep.subr.mxu0 %v440_v27  ;;  %2323 = vmatpush3.msra.mxu1 %v457_v28  ;;  %v542_v27 = vld [vmem:[#allocation5 + $0x9b0] sm:$0xff]  ;;  %v172_v28 = vld [vmem:[#allocation2 + $0x420] sm:$0xff] }
  0xce   :  { %2269 = vmatpush3.msra.mxu0 %v424_v29  ;;  %1310 = vmatprep.mubr.f32.mxu0 %v53_v30  ;;  %v175_v29 = vld [vmem:[#allocation2 + $0x438] sm:$0xff]  ;;  %v509_v30 = vld [vmem:[#allocation5 + $0x8a8] sm:$0xff] }
  0xcf   :  { %2324 = vmatprep.subr.mxu1 %v472_v31  ;;  %1311 = vmatmul.mubr.f32.vlgmr.msra.gmra.mxu0 %v52_v32  ;;  %v526_v31 = vld [vmem:[#allocation5 + $0x930] sm:$0xff] }
  0xd0   :  { %2325 = vmatpush3.msra.mxu1 %v456_v33  ;;  %1415 = vmatprep.mubr.f32.mxu1 %v55_v34  ;;  %v174_v32 = vld [vmem:[#allocation2 + $0x430] sm:$0xff]  ;;  %v493_v33 = vld [vmem:[#allocation5 + $0x828] sm:$0xff] }
  0xd1   :  { %2350 = vmatprep.subr.mxu0 %v519_v35  ;;  %1416 = vmatmul.mubr.f32.vlgmr.msra.gmra.mxu1 %v54_v36  ;;  %v541_v34 = vld [vmem:[#allocation5 + $0x9a8] sm:$0xff]  ;;  %v508_v35 = vld [vmem:[#allocation5 + $0x8a0] sm:$0xff] }
  0xd2   :  { %2351 = vmatpush3.msra.mxu0 %v503_v37  ;;  %2406 = vmatprep.subr.mxu1 %v551_v38  ;;  %v525_v36 = vld [vmem:[#allocation5 + $0x928] sm:$0xff]  ;;  %v492_v38 = vld [vmem:[#allocation5 + $0x820] sm:$0xff] }
  0xd3   :  { %2352 = vmatprep.subr.mxu0 %v518_v39  ;;  %2407 = vmatpush3.msra.mxu1 %v535_v40  ;;  %v197_v37 = vld [vmem:[#allocation2 + $0x4e8] sm:$0xff]  ;;  %v540_v39 = vld [vmem:[#allocation5 + $0x9a0] sm:$0xff] }
  0xd4   :  { %1315 = vmatprep.mubr.f32.mxu0 %v77_v41  ;;  %2353 = vmatpush3.msra.mxu0 %v502_v42  ;;  %v196_v40 = vld [vmem:[#allocation2 + $0x4e0] sm:$0xff]  ;;  %v199_v41 = vld [vmem:[#allocation2 + $0x4f8] sm:$0xff] }
  0xd5   :  { %2408 = vmatprep.subr.mxu1 %v550_v43  ;;  %1316 = vmatmul.mubr.f32.gmra.mxu0 %v76_v44  ;;  %v507_v42 = vld [vmem:[#allocation5 + $0x898] sm:$0xff]  ;;  %v524_v43 = vld [vmem:[#allocation5 + $0x920] sm:$0xff]  ;;  %v198_v44 = vld [vmem:[#allocation2 + $0x4f0] sm:$0xff] }
  0xd6   :  { %1420 = vmatprep.mubr.f32.mxu1 %v79_v45  ;;  %2354 = vmatprep.subr.mxu0 %v517_v46  ;;  %v491_v45 = vld [vmem:[#allocation5 + $0x818] sm:$0xff] }
  0xd7   :  { %2409 = vmatpush3.msra.mxu1 %v534_v47  ;;  %2355 = vmatpush3.msra.mxu0 %v501_v49  ;;  %v539_v46 = vld [vmem:[#allocation5 + $0x998] sm:$0xff]  ;;  %v506_v47 = vld [vmem:[#allocation5 + $0x890] sm:$0xff]  ;;  %v221_v49 = vld [vmem:[#allocation2 + $0x5a8] sm:$0xff] }
  0xd8   :  { %1421 = vmatmul.mubr.f32.gmra.mxu1 %v78_v48  ;;  %2410 = vmatprep.subr.mxu1 %v549_v50  ;;  %v523_v48 = vld [vmem:[#allocation5 + $0x918] sm:$0xff]  ;;  %v490_v50 = vld [vmem:[#allocation5 + $0x810] sm:$0xff] }
  0xd9   :  { %2356 = vmatprep.subr.mxu0 %v516_v51  ;;  %2411 = vmatpush3.msra.mxu1 %v533_v52  ;;  %v538_v51 = vld [vmem:[#allocation5 + $0x990] sm:$0xff]  ;;  %v220_v52 = vld [vmem:[#allocation2 + $0x5a0] sm:$0xff] }
  0xda   :  { %1320 = vmatprep.mubr.f32.mxu0 %v101_v53  ;;  %2357 = vmatpush3.msra.mxu0 %v500_v54  ;;  %v223_v53 = vld [vmem:[#allocation2 + $0x5b8] sm:$0xff]  ;;  %v505_v54 = vld [vmem:[#allocation5 + $0x888] sm:$0xff] }
  0xdb   :  { %2412 = vmatprep.subr.mxu1 %v548_v55  ;;  %1321 = vmatmul.mubr.f32.gmra.mxu0 %v100_v56  ;;  %v522_v55 = vld [vmem:[#allocation5 + $0x910] sm:$0xff] }
  0xdc   :  { %1425 = vmatprep.mubr.f32.mxu1 %v103_v57  ;;  %2358 = vmatprep.subr.mxu0 %v515_v58  ;;  %v222_v56 = vld [vmem:[#allocation2 + $0x5b0] sm:$0xff]  ;;  %v489_v57 = vld [vmem:[#allocation5 + $0x808] sm:$0xff] }
  0xdd   :  { %2413 = vmatpush3.msra.mxu1 %v532_v59  ;;  %2359 = vmatpush3.msra.mxu0 %v499_v61  ;;  %v537_v58 = vld [vmem:[#allocation5 + $0x988] sm:$0xff]  ;;  %v504_v59 = vld [vmem:[#allocation5 + $0x880] sm:$0xff] }
  0xde   :  { %1426 = vmatmul.mubr.f32.gmra.mxu1 %v102_v60  ;;  %2414 = vmatprep.subr.mxu1 %v547_v62  ;;  %v521_v60 = vld [vmem:[#allocation5 + $0x908] sm:$0xff]  ;;  %v488_v61 = vld [vmem:[#allocation5 + $0x800] sm:$0xff] }
  0xdf   :  { %2360 = vmatprep.subr.mxu0 %v514_v63  ;;  %2415 = vmatpush3.msra.mxu1 %v531_v0  ;;  %v57_v62 = vld [vmem:[#allocation2 + $0x88] sm:$0xff]  ;;  %v536_v63 = vld [vmem:[#allocation5 + $0x980] sm:$0xff] }
  0xe0   :  { %1325 = vmatprep.mubr.f32.mxu0 %v125_v1  ;;  %2361 = vmatpush3.msra.mxu0 %v498_v2  ;;  %v56_v0 = vld [vmem:[#allocation2 + $0x80] sm:$0xff]  ;;  %v59_v2 = vld [vmem:[#allocation2 + $0x98] sm:$0xff] }
  0xe1   :  { %2416 = vmatprep.subr.mxu1 %v546_v3  ;;  %1326 = vmatmul.mubr.f32.gmra.mxu0 %v124_v4  ;;  %v520_v1 = vld [vmem:[#allocation5 + $0x900] sm:$0xff]  ;;  %v583_v3 = vld [vmem:[#allocation5 + $0xaf8] sm:$0xff]  ;;  %v58_v4 = vld [vmem:[#allocation2 + $0x90] sm:$0xff] }
  0xe2   :  { %1430 = vmatprep.mubr.f32.mxu1 %v127_v5  ;;  %2362 = vmatprep.subr.mxu0 %v513_v6  ;;  %v567_v5 = vld [vmem:[#allocation5 + $0xa78] sm:$0xff] }
  0xe3   :  { %2417 = vmatpush3.msra.mxu1 %v530_v7  ;;  %2363 = vmatpush3.msra.mxu0 %v497_v9  ;;  %v615_v6 = vld [vmem:[#allocation5 + $0xbf8] sm:$0xff]  ;;  %v582_v7 = vld [vmem:[#allocation5 + $0xaf0] sm:$0xff]  ;;  %v81_v9 = vld [vmem:[#allocation2 + $0x148] sm:$0xff] }
  0xe4   :  { %1431 = vmatmul.mubr.f32.gmra.mxu1 %v126_v8  ;;  %2418 = vmatprep.subr.mxu1 %v545_v10  ;;  %v599_v8 = vld [vmem:[#allocation5 + $0xb78] sm:$0xff] }
  0xe5   :  { %2364 = vmatprep.subr.mxu0 %v512_v11  ;;  %2419 = vmatpush3.msra.mxu1 %v529_v12  ;;  %v566_v12 = vld [vmem:[#allocation5 + $0xa70] sm:$0xff] }
  0xe6   :  { %1330 = vmatprep.mubr.f32.mxu0 %v149_v13  ;;  %2365 = vmatpush3.msra.mxu0 %v496_v14  ;;  %v614_v13 = vld [vmem:[#allocation5 + $0xbf0] sm:$0xff]  ;;  %v80_v14 = vld [vmem:[#allocation2 + $0x140] sm:$0xff] }
  0xe7   :  { %2420 = vmatprep.subr.mxu1 %v544_v15  ;;  %1331 = vmatmul.mubr.f32.gmra.mxu0 %v148_v16  ;;  %v83_v15 = vld [vmem:[#allocation2 + $0x158] sm:$0xff] }
  0xe8   :  { %1435 = vmatprep.mubr.f32.mxu1 %v151_v17  ;;  %2366 = vmatprep.subr.mxu0 %v511_v18  ;;  %v581_v18 = vld [vmem:[#allocation5 + $0xae8] sm:$0xff] }
  0xe9   :  { %2421 = vmatpush3.msra.mxu1 %v528_v19  ;;  %2367 = vmatpush3.msra.mxu0 %v495_v21  ;;  %v598_v19 = vld [vmem:[#allocation5 + $0xb70] sm:$0xff] }
  0xea   :  { %1436 = vmatmul.mubr.f32.gmra.mxu1 %v150_v20  ;;  %2422 = vmatprep.subr.mxu1 %v543_v22  ;;  %v82_v22 = vld [vmem:[#allocation2 + $0x150] sm:$0xff] }
  0xeb   :  { %2368 = vmatprep.subr.mxu0 %v510_v23  ;;  %2423 = vmatpush3.msra.mxu1 %v527_v24  ;;  %v565_v23 = vld [vmem:[#allocation5 + $0xa68] sm:$0xff] }
  0xec   :  { %1335 = vmatprep.mubr.f32.mxu0 %v173_v25  ;;  %2369 = vmatpush3.msra.mxu0 %v494_v26  ;;  %v613_v24 = vld [vmem:[#allocation5 + $0xbe8] sm:$0xff]  ;;  %v580_v25 = vld [vmem:[#allocation5 + $0xae0] sm:$0xff] }
  0xed   :  { %2424 = vmatprep.subr.mxu1 %v542_v27  ;;  %1336 = vmatmul.mubr.f32.gmra.mxu0 %v172_v28  ;;  %v597_v28 = vld [vmem:[#allocation5 + $0xb68] sm:$0xff] }
  0xee   :  { %1440 = vmatprep.mubr.f32.mxu1 %v175_v29  ;;  %2370 = vmatprep.subr.mxu0 %v509_v30  ;;  %v105_v29 = vld [vmem:[#allocation2 + $0x208] sm:$0xff] }
  0xef   :  { %2425 = vmatpush3.msra.mxu1 %v526_v31  ;;  %2371 = vmatpush3.msra.mxu0 %v493_v33  ;;  %v564_v31 = vld [vmem:[#allocation5 + $0xa60] sm:$0xff] }
  0xf0   :  { %1441 = vmatmul.mubr.f32.gmra.mxu1 %v174_v32  ;;  %2426 = vmatprep.subr.mxu1 %v541_v34  ;;  %v612_v32 = vld [vmem:[#allocation5 + $0xbe0] sm:$0xff] }
  0xf1   :  { %2372 = vmatprep.subr.mxu0 %v508_v35  ;;  %2427 = vmatpush3.msra.mxu1 %v525_v36  ;;  %v104_v34 = vld [vmem:[#allocation2 + $0x200] sm:$0xff]  ;;  %v107_v35 = vld [vmem:[#allocation2 + $0x218] sm:$0xff] }
  0xf2   :  { %1340 = vmatprep.mubr.f32.mxu0 %v197_v37  ;;  %2373 = vmatpush3.msra.mxu0 %v492_v38  ;;  %v579_v38 = vld [vmem:[#allocation5 + $0xad8] sm:$0xff] }
  0xf3   :  { %2428 = vmatprep.subr.mxu1 %v540_v39  ;;  %1341 = vmatmul.mubr.f32.gmra.mxu0 %v196_v40  ;;  %v596_v39 = vld [vmem:[#allocation5 + $0xb60] sm:$0xff] }
  0xf4   :  { %1445 = vmatprep.mubr.f32.mxu1 %v199_v41  ;;  %2374 = vmatprep.subr.mxu0 %v507_v42  ;;  %v106_v41 = vld [vmem:[#allocation2 + $0x210] sm:$0xff]  ;;  %v563_v42 = vld [vmem:[#allocation5 + $0xa58] sm:$0xff] }
  0xf5   :  { %2429 = vmatpush3.msra.mxu1 %v524_v43  ;;  %2375 = vmatpush3.msra.mxu0 %v491_v45  ;;  %v611_v43 = vld [vmem:[#allocation5 + $0xbd8] sm:$0xff] }
  0xf6   :  { %1446 = vmatmul.mubr.f32.gmra.mxu1 %v198_v44  ;;  %2430 = vmatprep.subr.mxu1 %v539_v46  ;;  %v578_v44 = vld [vmem:[#allocation5 + $0xad0] sm:$0xff] }
  0xf7   :  { %2376 = vmatprep.subr.mxu0 %v506_v47  ;;  %2431 = vmatpush3.msra.mxu1 %v523_v48  ;;  %v595_v47 = vld [vmem:[#allocation5 + $0xb58] sm:$0xff]  ;;  %v129_v48 = vld [vmem:[#allocation2 + $0x2c8] sm:$0xff] }
  0xf8   :  { %1345 = vmatprep.mubr.f32.mxu0 %v221_v49  ;;  %2377 = vmatpush3.msra.mxu0 %v490_v50  ;;  %v562_v50 = vld [vmem:[#allocation5 + $0xa50] sm:$0xff] }
  0xf9   :  { %2432 = vmatprep.subr.mxu1 %v538_v51  ;;  %1346 = vmatmul.mubr.f32.gmra.mxu0 %v220_v52  ;;  %v610_v51 = vld [vmem:[#allocation5 + $0xbd0] sm:$0xff] }
  0xfa   :  { %1450 = vmatprep.mubr.f32.mxu1 %v223_v53  ;;  %2378 = vmatprep.subr.mxu0 %v505_v54  ;;  %v128_v53 = vld [vmem:[#allocation2 + $0x2c0] sm:$0xff]  ;;  %v131_v54 = vld [vmem:[#allocation2 + $0x2d8] sm:$0xff] }
  0xfb   :  { %2433 = vmatpush3.msra.mxu1 %v522_v55  ;;  %2379 = vmatpush3.msra.mxu0 %v489_v57  ;;  %v577_v57 = vld [vmem:[#allocation5 + $0xac8] sm:$0xff] }
  0xfc   :  { %1451 = vmatmul.mubr.f32.gmra.mxu1 %v222_v56  ;;  %2434 = vmatprep.subr.mxu1 %v537_v58  ;;  %v594_v58 = vld [vmem:[#allocation5 + $0xb50] sm:$0xff] }
  0xfd   :  { %2380 = vmatprep.subr.mxu0 %v504_v59  ;;  %2435 = vmatpush3.msra.mxu1 %v521_v60  ;;  %v130_v60 = vld [vmem:[#allocation2 + $0x2d0] sm:$0xff] }
  0xfe   :  { %2381 = vmatpush3.msra.mxu0 %v488_v61  ;;  %1520 = vmatprep.mubr.f32.mxu0 %v57_v62  ;;  %v561_v61 = vld [vmem:[#allocation5 + $0xa48] sm:$0xff] }
  0xff   :  { %2436 = vmatprep.subr.mxu1 %v536_v63  ;;  %1521 = vmatmul.mubr.f32.vlgmr.msra.gmra.mxu0 %v56_v0  ;;  %v609_v62 = vld [vmem:[#allocation5 + $0xbc8] sm:$0xff]  ;;  %v576_v63 = vld [vmem:[#allocation5 + $0xac0] sm:$0xff] }
 0x100   :  { %2437 = vmatpush3.msra.mxu1 %v520_v1  ;;  %1625 = vmatprep.mubr.f32.mxu1 %v59_v2  ;;  %v1934_v10 = vpop.f32.mrf.mxu0  ;;  %v593_v2 = vld [vmem:[#allocation5 + $0xb48] sm:$0xff] }
 0x101   :  { %2462 = vmatprep.subr.mxu0 %v583_v3  ;;  %v1990_v11 = vpop.f32.mrf.mxu1  ;;  %1626 = vmatmul.mubr.f32.vlgmr.msra.gmra.mxu1 %v58_v4  ;;  %v153_v3 = vld [vmem:[#allocation2 + $0x388] sm:$0xff] }
 0x102   :  { %2463 = vmatpush3.msra.mxu0 %v567_v5  ;;  %2518 = vmatprep.subr.mxu1 %v615_v6  ;;  %v1935_v16 = vpop.f32.mrf.mxu0  ;;  %v560_v5 = vld [vmem:[#allocation5 + $0xa40] sm:$0xff] }
 0x103   :  { %2464 = vmatprep.subr.mxu0 %v582_v7  ;;  %v1991_v17 = vpop.f32.mrf.mxu1  ;;  %2519 = vmatpush3.msra.mxu1 %v599_v8  ;;  %v1936_v20 = vadd.f32 %v1935_v16, %v1934_v10  ;;  %v608_v6 = vld [vmem:[#allocation5 + $0xbc0] sm:$0xff]  ;;  %v559_v16 = vld [vmem:[#allocation5 + $0xa38] sm:$0xff] }
 0x104   :  { %1525 = vmatprep.mubr.f32.mxu0 %v81_v9  ;;  %v1992_v21 = vadd.f32 %v1991_v17, %v1990_v11  ;;  %2465 = vmatpush3.msra.mxu0 %v566_v12  ;;  %v152_v8 = vld [vmem:[#allocation2 + $0x380] sm:$0xff]  ;;  %v155_v9 = vld [vmem:[#allocation2 + $0x398] sm:$0xff] }
 0x105   :  { %2520 = vmatprep.subr.mxu1 %v614_v13  ;;  %1526 = vmatmul.mubr.f32.gmra.mxu0 %v80_v14  ;;  %v575_v12 = vld [vmem:[#allocation5 + $0xab8] sm:$0xff]  ;;  %v592_v13 = vld [vmem:[#allocation5 + $0xb40] sm:$0xff] }
 0x106   :  { %1630 = vmatprep.mubr.f32.mxu1 %v83_v15  ;;  %v2678_v26 = vadd.f32 %v1992_v21, %v1936_v20  ;;  %v1937_v27 = vpop.f32.mrf.mxu0  ;;  %2466 = vmatprep.subr.mxu0 %v581_v18  ;;  %v1993_v30 = vpop.f32.mrf.mxu1  ;;  %v154_v15 = vld [vmem:[#allocation2 + $0x390] sm:$0xff]  ;;  %v607_v17 = vld [vmem:[#allocation5 + $0xbb8] sm:$0xff] }
 0x107   :  { %2521 = vmatpush3.msra.mxu1 %v598_v19  ;;  %2467 = vmatpush3.msra.mxu0 %v565_v23  ;;  %v574_v18 = vld [vmem:[#allocation5 + $0xab0] sm:$0xff]  ;;  %v591_v21 = vld [vmem:[#allocation5 + $0xb38] sm:$0xff] }
 0x108   :  { %1631 = vmatmul.mubr.f32.gmra.mxu1 %v82_v22  ;;  %v1938_v33 = vpop.f32.mrf.mxu0  ;;  %2522 = vmatprep.subr.mxu1 %v613_v24  ;;  %v1994_v37 = vpop.f32.mrf.mxu1  ;;  %v177_v22 = vld [vmem:[#allocation2 + $0x448] sm:$0xff]  ;;  %v558_v24 = vld [vmem:[#allocation5 + $0xa30] sm:$0xff] }
 0x109   :  { %2468 = vmatprep.subr.mxu0 %v580_v25  ;;  %v1939_v36 = vadd.f32 %v1938_v33, %v1937_v27  ;;  %2523 = vmatpush3.msra.mxu1 %v597_v28  ;;  %v1995_v40 = vadd.f32 %v1994_v37, %v1993_v30  ;;  %v606_v25 = vld [vmem:[#allocation5 + $0xbb0] sm:$0xff]  ;;  %v176_v28 = vld [vmem:[#allocation2 + $0x440] sm:$0xff]  ;;  %v605_v37 = vld [vmem:[#allocation5 + $0xba8] sm:$0xff] }
 0x10a   :  { %1530 = vmatprep.mubr.f32.mxu0 %v105_v29  ;;  %2469 = vmatpush3.msra.mxu0 %v564_v31  ;;  %v179_v29 = vld [vmem:[#allocation2 + $0x458] sm:$0xff]  ;;  %v590_v33 = vld [vmem:[#allocation5 + $0xb30] sm:$0xff] }
 0x10b   :  { %2524 = vmatprep.subr.mxu1 %v612_v32  ;;  %1531 = vmatmul.mubr.f32.gmra.mxu0 %v104_v34  ;;  %v2680_v45 = vadd.f32 %v1995_v40, %v1939_v36  ;;  %v573_v32 = vld [vmem:[#allocation5 + $0xaa8] sm:$0xff] }
 0x10c   :  { %1635 = vmatprep.mubr.f32.mxu1 %v107_v35  ;;  %v1940_v46 = vpop.f32.mrf.mxu0  ;;  %2470 = vmatprep.subr.mxu0 %v579_v38  ;;  %v1996_v49 = vpop.f32.mrf.mxu1  ;;  %v178_v35 = vld [vmem:[#allocation2 + $0x450] sm:$0xff]  ;;  %v557_v36 = vld [vmem:[#allocation5 + $0xa28] sm:$0xff]  ;;  %v572_v38 = vld [vmem:[#allocation5 + $0xaa0] sm:$0xff] }
 0x10d   :  { %2525 = vmatpush3.msra.mxu1 %v596_v39  ;;  %2471 = vmatpush3.msra.mxu0 %v563_v42  ;;  %v201_v42 = vld [vmem:[#allocation2 + $0x508] sm:$0xff] }
 0x10e   :  { %1636 = vmatmul.mubr.f32.gmra.mxu1 %v106_v41  ;;  %v1941_v52 = vpop.f32.mrf.mxu0  ;;  %2526 = vmatprep.subr.mxu1 %v611_v43  ;;  %v1997_v56 = vpop.f32.mrf.mxu1  ;;  %v589_v41 = vld [vmem:[#allocation5 + $0xb28] sm:$0xff] }
 0x10f   :  { %2472 = vmatprep.subr.mxu0 %v578_v44  ;;  %v1942_v55 = vadd.f32 %v1941_v52, %v1940_v46  ;;  %2527 = vmatpush3.msra.mxu1 %v595_v47  ;;  %v1998_v59 = vadd.f32 %v1997_v56, %v1996_v49  ;;  %v556_v44 = vld [vmem:[#allocation5 + $0xa20] sm:$0xff]  ;;  %v203_v49 = vld [vmem:[#allocation2 + $0x518] sm:$0xff] }
 0x110   :  { %1535 = vmatprep.mubr.f32.mxu0 %v129_v48  ;;  %2473 = vmatpush3.msra.mxu0 %v562_v50  ;;  %v604_v46 = vld [vmem:[#allocation5 + $0xba0] sm:$0xff]  ;;  %v571_v52 = vld [vmem:[#allocation5 + $0xa98] sm:$0xff] }
 0x111   :  { %2528 = vmatprep.subr.mxu1 %v610_v51  ;;  %1536 = vmatmul.mubr.f32.gmra.mxu0 %v128_v53  ;;  %v2682_v0 = vadd.f32 %v1998_v59, %v1942_v55  ;;  %v200_v48 = vld [vmem:[#allocation2 + $0x500] sm:$0xff]  ;;  %v202_v55 = vld [vmem:[#allocation2 + $0x510] sm:$0xff]  ;;  %v555_v56 = vld [vmem:[#allocation5 + $0xa18] sm:$0xff] }
 0x112   :  { %1640 = vmatprep.mubr.f32.mxu1 %v131_v54  ;;  %v1943_v1 = vpop.f32.mrf.mxu0  ;;  %2474 = vmatprep.subr.mxu0 %v577_v57  ;;  %v1999_v4 = vpop.f32.mrf.mxu1  ;;  %v588_v53 = vld [vmem:[#allocation5 + $0xb20] sm:$0xff]  ;;  %v603_v57 = vld [vmem:[#allocation5 + $0xb98] sm:$0xff] }
 0x113   :  { %2529 = vmatpush3.msra.mxu1 %v594_v58  ;;  %2475 = vmatpush3.msra.mxu0 %v561_v61  ;;  %v570_v58 = vld [vmem:[#allocation5 + $0xa90] sm:$0xff]  ;;  %v587_v61 = vld [vmem:[#allocation5 + $0xb18] sm:$0xff] }
 0x114   :  { %1641 = vmatmul.mubr.f32.gmra.mxu1 %v130_v60  ;;  %v1944_v7 = vpop.f32.mrf.mxu0  ;;  %2530 = vmatprep.subr.mxu1 %v609_v62  ;;  %v2000_v11 = vpop.f32.mrf.mxu1  ;;  %v225_v62 = vld [vmem:[#allocation2 + $0x5c8] sm:$0xff] }
 0x115   :  { %2476 = vmatprep.subr.mxu0 %v576_v63  ;;  %v1945_v10 = vadd.f32 %v1944_v7, %v1943_v1  ;;  %2531 = vmatpush3.msra.mxu1 %v593_v2  ;;  %v2001_v14 = vadd.f32 %v2000_v11, %v1999_v4  ;;  %v554_v1 = vld [vmem:[#allocation5 + $0xa10] sm:$0xff]  ;;  %v224_v4 = vld [vmem:[#allocation2 + $0x5c0] sm:$0xff] }
 0x116   :  { %1540 = vmatprep.mubr.f32.mxu0 %v153_v3  ;;  %2477 = vmatpush3.msra.mxu0 %v560_v5  ;;  %v602_v2 = vld [vmem:[#allocation5 + $0xb90] sm:$0xff]  ;;  %v227_v5 = vld [vmem:[#allocation2 + $0x5d8] sm:$0xff] }
 0x117   :  { %2532 = vmatprep.subr.mxu1 %v608_v6  ;;  %1541 = vmatmul.mubr.f32.gmra.mxu0 %v152_v8  ;;  %v2684_v19 = vadd.f32 %v2001_v14, %v1945_v10  ;;  %v569_v8 = vld [vmem:[#allocation5 + $0xa88] sm:$0xff]  ;;  %v226_v11 = vld [vmem:[#allocation2 + $0x5d0] sm:$0xff]  ;;  %v568_v14 = vld [vmem:[#allocation5 + $0xa80] sm:$0xff] }
 0x118   :  { %1645 = vmatprep.mubr.f32.mxu1 %v155_v9  ;;  %v1946_v20 = vpop.f32.mrf.mxu0  ;;  %2478 = vmatprep.subr.mxu0 %v575_v12  ;;  %v2002_v23 = vpop.f32.mrf.mxu1  ;;  %v586_v9 = vld [vmem:[#allocation5 + $0xb10] sm:$0xff]  ;;  %v553_v12 = vld [vmem:[#allocation5 + $0xa08] sm:$0xff] }
 0x119   :  { %2533 = vmatpush3.msra.mxu1 %v592_v13  ;;  %2479 = vmatpush3.msra.mxu0 %v559_v16  ;;  %v601_v13 = vld [vmem:[#allocation5 + $0xb88] sm:$0xff] }
 0x11a   :  { %1646 = vmatmul.mubr.f32.gmra.mxu1 %v154_v15  ;;  %v1947_v27 = vpop.f32.mrf.mxu0  ;;  %2534 = vmatprep.subr.mxu1 %v607_v17  ;;  %v2003_v31 = vpop.f32.mrf.mxu1  ;;  %v585_v17 = vld [vmem:[#allocation5 + $0xb08] sm:$0xff] }
 0x11b   :  { %2480 = vmatprep.subr.mxu0 %v574_v18  ;;  %v1948_v30 = vadd.f32 %v1947_v27, %v1946_v20  ;;  %2535 = vmatpush3.msra.mxu1 %v591_v21  ;;  %v2004_v34 = vadd.f32 %v2003_v31, %v2002_v23  ;;  %v552_v18 = vld [vmem:[#allocation5 + $0xa00] sm:$0xff]  ;;  %v61_v21 = vld [vmem:[#allocation2 + $0xa8] sm:$0xff] }
 0x11c   :  { %1545 = vmatprep.mubr.f32.mxu0 %v177_v22  ;;  %2481 = vmatpush3.msra.mxu0 %v558_v24  ;;  %v600_v22 = vld [vmem:[#allocation5 + $0xb80] sm:$0xff] }
 0x11d   :  { %2536 = vmatprep.subr.mxu1 %v606_v25  ;;  %1546 = vmatmul.mubr.f32.gmra.mxu0 %v176_v28  ;;  %v2686_v39 = vadd.f32 %v2004_v34, %v1948_v30  ;;  %v60_v24 = vld [vmem:[#allocation2 + $0xa0] sm:$0xff]  ;;  %v85_v30 = vld [vmem:[#allocation2 + $0x168] sm:$0xff] }
 0x11e   :  { %1650 = vmatprep.mubr.f32.mxu1 %v179_v29  ;;  %v1949_v40 = vpop.f32.mrf.mxu0  ;;  %2482 = vmatprep.subr.mxu0 %v573_v32  ;;  %v2005_v43 = vpop.f32.mrf.mxu1  ;;  %v584_v25 = vld [vmem:[#allocation5 + $0xb00] sm:$0xff]  ;;  %v63_v29 = vld [vmem:[#allocation2 + $0xb8] sm:$0xff]  ;;  %v62_v32 = vld [vmem:[#allocation2 + $0xb0] sm:$0xff] }
 0x11f   :  { %2537 = vmatpush3.msra.mxu1 %v590_v33  ;;  %2483 = vmatpush3.msra.mxu0 %v557_v36  ;;  %v87_v33 = vld [vmem:[#allocation2 + $0x178] sm:$0xff]  ;;  %v84_v36 = vld [vmem:[#allocation2 + $0x160] sm:$0xff] }
 0x120   :  { %1651 = vmatmul.mubr.f32.gmra.mxu1 %v178_v35  ;;  %v1950_v47 = vpop.f32.mrf.mxu0  ;;  %2538 = vmatprep.subr.mxu1 %v605_v37  ;;  %v2006_v51 = vpop.f32.mrf.mxu1  ;;  %v109_v37 = vld [vmem:[#allocation2 + $0x228] sm:$0xff] }
 0x121   :  { %2484 = vmatprep.subr.mxu0 %v572_v38  ;;  %v1951_v50 = vadd.f32 %v1950_v47, %v1949_v40  ;;  %2539 = vmatpush3.msra.mxu1 %v589_v41  ;;  %v2007_v54 = vadd.f32 %v2006_v51, %v2005_v43  ;;  %v86_v41 = vld [vmem:[#allocation2 + $0x170] sm:$0xff]  ;;  %v111_v43 = vld [vmem:[#allocation2 + $0x238] sm:$0xff] }
 0x122   :  { %1550 = vmatprep.mubr.f32.mxu0 %v201_v42  ;;  %2485 = vmatpush3.msra.mxu0 %v556_v44  ;;  %v110_v51 = vld [vmem:[#allocation2 + $0x230] sm:$0xff] }
 0x123   :  { %2540 = vmatprep.subr.mxu1 %v604_v46  ;;  %1551 = vmatmul.mubr.f32.gmra.mxu0 %v200_v48  ;;  %v2688_v59 = vadd.f32 %v2007_v54, %v1951_v50  ;;  %v108_v46 = vld [vmem:[#allocation2 + $0x220] sm:$0xff] }
 0x124   :  { %1655 = vmatprep.mubr.f32.mxu1 %v203_v49  ;;  %v1952_v60 = vpop.f32.mrf.mxu0  ;;  %2486 = vmatprep.subr.mxu0 %v571_v52  ;;  %v2008_v63 = vpop.f32.mrf.mxu1  ;;  %v133_v49 = vld [vmem:[#allocation2 + $0x2e8] sm:$0xff] }
 0x125   :  { %2541 = vmatpush3.msra.mxu1 %v588_v53  ;;  %2487 = vmatpush3.msra.mxu0 %v555_v56  ;;  %v135_v53 = vld [vmem:[#allocation2 + $0x2f8] sm:$0xff]  ;;  %v132_v56 = vld [vmem:[#allocation2 + $0x2e0] sm:$0xff] }
 0x126   :  { %1656 = vmatmul.mubr.f32.gmra.mxu1 %v202_v55  ;;  %v1953_v3 = vpop.f32.mrf.mxu0  ;;  %2542 = vmatprep.subr.mxu1 %v603_v57  ;;  %v2009_v7 = vpop.f32.mrf.mxu1 }
 0x127   :  { %2488 = vmatprep.subr.mxu0 %v570_v58  ;;  %v1954_v6 = vadd.f32 %v1953_v3, %v1952_v60  ;;  %2543 = vmatpush3.msra.mxu1 %v587_v61  ;;  %v2010_v10 = vadd.f32 %v2009_v7, %v2008_v63  ;;  %v157_v58 = vld [vmem:[#allocation2 + $0x3a8] sm:$0xff]  ;;  %v159_v63 = vld [vmem:[#allocation2 + $0x3b8] sm:$0xff]  ;;  %v158_v7 = vld [vmem:[#allocation2 + $0x3b0] sm:$0xff] }
 0x128   :  { %1555 = vmatprep.mubr.f32.mxu0 %v225_v62  ;;  %2489 = vmatpush3.msra.mxu0 %v554_v1 }
 0x129   :  { %2544 = vmatprep.subr.mxu1 %v602_v2  ;;  %1556 = vmatmul.mubr.f32.gmra.mxu0 %v224_v4  ;;  %v2690_v15 = vadd.f32 %v2010_v10, %v1954_v6  ;;  %v156_v2 = vld [vmem:[#allocation2 + $0x3a0] sm:$0xff]  ;;  %v181_v4 = vld [vmem:[#allocation2 + $0x468] sm:$0xff] }
 0x12a   :  { %1660 = vmatprep.mubr.f32.mxu1 %v227_v5  ;;  %v1955_v16 = vpop.f32.mrf.mxu0  ;;  %2490 = vmatprep.subr.mxu0 %v569_v8  ;;  %v2011_v20 = vpop.f32.mrf.mxu1 }
 0x12b   :  { %2545 = vmatpush3.msra.mxu1 %v586_v9  ;;  %2491 = vmatpush3.msra.mxu0 %v553_v12  ;;  %v183_v9 = vld [vmem:[#allocation2 + $0x478] sm:$0xff] }
 0x12c   :  { %1661 = vmatmul.mubr.f32.gmra.mxu1 %v226_v11  ;;  %v1956_v23 = vpop.f32.mrf.mxu0  ;;  %2546 = vmatprep.subr.mxu1 %v601_v13  ;;  %v2012_v28 = vpop.f32.mrf.mxu1  ;;  %v205_v13 = vld [vmem:[#allocation2 + $0x528] sm:$0xff] }
 0x12d   :  { %2492 = vmatprep.subr.mxu0 %v568_v14  ;;  %v1957_v27 = vadd.f32 %v1956_v23, %v1955_v16  ;;  %2547 = vmatpush3.msra.mxu1 %v585_v17  ;;  %v2013_v31 = vadd.f32 %v2012_v28, %v2011_v20  ;;  %v182_v16 = vld [vmem:[#allocation2 + $0x470] sm:$0xff] }
 0x12e   :  { %2493 = vmatpush3.msra.mxu0 %v552_v18  ;;  %1730 = vmatprep.mubr.f32.mxu0 %v61_v21  ;;  %v207_v18 = vld [vmem:[#allocation2 + $0x538] sm:$0xff] }
 0x12f   :  { %2548 = vmatprep.subr.mxu1 %v600_v22  ;;  %1731 = vmatmul.mubr.f32.vlgmr.msra.gmra.mxu0 %v60_v24  ;;  %v2692_v34 = vadd.f32 %v2013_v31, %v1957_v27  ;;  %v2046_v35 = vpop.f32.mrf.mxu0  ;;  %v204_v22 = vld [vmem:[#allocation2 + $0x520] sm:$0xff]  ;;  %v229_v24 = vld [vmem:[#allocation2 + $0x5e8] sm:$0xff] }
 0x130   :  { %2549 = vmatpush3.msra.mxu1 %v584_v25  ;;  %1835 = vmatprep.mubr.f32.mxu1 %v63_v29  ;;  %v231_v29 = vld [vmem:[#allocation2 + $0x5f8] sm:$0xff]  ;;  %v228_v31 = vld [vmem:[#allocation2 + $0x5e0] sm:$0xff] }
 0x131   :  { %1735 = vmatprep.mubr.f32.mxu0 %v85_v30  ;;  %1836 = vmatmul.mubr.f32.vlgmr.msra.gmra.mxu1 %v62_v32  ;;  %v2102_v38 = vpop.f32.mrf.mxu1  ;;  %v2047_v40 = vpop.f32.mrf.mxu0 }
 0x132   :  { %1840 = vmatprep.mubr.f32.mxu1 %v87_v33  ;;  %v2048_v42 = vadd.f32 %v2047_v40, %v2046_v35 }
 0x133   :  { %1736 = vmatmul.mubr.f32.gmra.mxu0 %v84_v36  ;;  %v2103_v44 = vpop.f32.mrf.mxu1  ;;  %v230_v36 = vld [vmem:[#allocation2 + $0x5f0] sm:$0xff] }
 0x134   :  { %1740 = vmatprep.mubr.f32.mxu0 %v109_v37  ;;  %v893_v47 = vadd.f32 %v2048_v42, %v2678_v26  ;;  %v2104_v48 = vadd.f32 %v2103_v44, %v2102_v38  ;;  %v134_v26 = vld [vmem:[#allocation2 + $0x2f0] sm:$0xff] }
 0x135   :  { %1841 = vmatmul.mubr.f32.gmra.mxu1 %v86_v41  ;;  %v2049_v50 = vpop.f32.mrf.mxu0 }
 0x136   :  { %1845 = vmatprep.mubr.f32.mxu1 %v111_v43  ;;  %v2695_v52 = vadd.f32 %v2104_v48, %v893_v47 }
 0x137   :  { %1741 = vmatmul.mubr.f32.gmra.mxu0 %v108_v46  ;;  %v2050_v55 = vpop.f32.mrf.mxu0 }
 0x138   :  { %v2105_v54 = vpop.f32.mrf.mxu1  ;;  %1745 = vmatprep.mubr.f32.mxu0 %v133_v49  ;;  %v2051_v57 = vadd.f32 %v2050_v55, %v2049_v50 }
 0x139   :  { %1846 = vmatmul.mubr.f32.gmra.mxu1 %v110_v51 }
 0x13a   :  { %v2106_v60 = vpop.f32.mrf.mxu1  ;;  %1850 = vmatprep.mubr.f32.mxu1 %v135_v53  ;;  %v898_v61 = vadd.f32 %v2051_v57, %v2680_v45  ;;  %v180_v45 = vld [vmem:[#allocation2 + $0x460] sm:$0xff] }
 0x13b   :  { %v2107_v62 = vadd.f32 %v2106_v60, %v2105_v54  ;;  %1746 = vmatmul.mubr.f32.gmra.mxu0 %v132_v56  ;;  %v2052_v1 = vpop.f32.mrf.mxu0 }
 0x13c   :  { %1750 = vmatprep.mubr.f32.mxu0 %v157_v58 }
 0x13d   :  { %v2698_v3 = vadd.f32 %v2107_v62, %v898_v61  ;;  %1851 = vmatmul.mubr.f32.gmra.mxu1 %v134_v26  ;;  %v2053_v6 = vpop.f32.mrf.mxu0 }
 0x13e   :  { %v2108_v5 = vpop.f32.mrf.mxu1  ;;  %1855 = vmatprep.mubr.f32.mxu1 %v159_v63  ;;  %v2054_v8 = vadd.f32 %v2053_v6, %v2052_v1 }
 0x13f   :  { %1751 = vmatmul.mubr.f32.gmra.mxu0 %v156_v2 }
 0x140   :  { %v2109_v10 = vpop.f32.mrf.mxu1  ;;  %1755 = vmatprep.mubr.f32.mxu0 %v181_v4  ;;  %v903_v11 = vadd.f32 %v2054_v8, %v2682_v0  ;;  %v206_v0 = vld [vmem:[#allocation2 + $0x530] sm:$0xff] }
 0x141   :  { %v2110_v12 = vadd.f32 %v2109_v10, %v2108_v5  ;;  %1856 = vmatmul.mubr.f32.gmra.mxu1 %v158_v7  ;;  %v2055_v14 = vpop.f32.mrf.mxu0 }
 0x142   :  { %1860 = vmatprep.mubr.f32.mxu1 %v183_v9 }
 0x143   :  { %v2701_v17 = vadd.f32 %v2110_v12, %v903_v11  ;;  %1756 = vmatmul.mubr.f32.gmra.mxu0 %v180_v45  ;;  %v2056_v21 = vpop.f32.mrf.mxu0 }
 0x144   :  { %v2111_v20 = vpop.f32.mrf.mxu1  ;;  %1760 = vmatprep.mubr.f32.mxu0 %v205_v13  ;;  %v2057_v23 = vadd.f32 %v2056_v21, %v2055_v14 }
 0x145   :  { %1861 = vmatmul.mubr.f32.gmra.mxu1 %v182_v16 }
 0x146   :  { %v2112_v25 = vpop.f32.mrf.mxu1  ;;  %1865 = vmatprep.mubr.f32.mxu1 %v207_v18  ;;  %v908_v27 = vadd.f32 %v2057_v23, %v2684_v19 }
 0x147   :  { %v2113_v28 = vadd.f32 %v2112_v25, %v2111_v20  ;;  %1761 = vmatmul.mubr.f32.gmra.mxu0 %v204_v22  ;;  %v2058_v30 = vpop.f32.mrf.mxu0 }
 0x148   :  { %1765 = vmatprep.mubr.f32.mxu0 %v229_v24 }
 0x149   :  { %v2704_v32 = vadd.f32 %v2113_v28, %v908_v27  ;;  %1866 = vmatmul.mubr.f32.gmra.mxu1 %v206_v0  ;;  %v2059_v35 = vpop.f32.mrf.mxu0 }
 0x14a   :  { %v2114_v33 = vpop.f32.mrf.mxu1  ;;  %1870 = vmatprep.mubr.f32.mxu1 %v231_v29  ;;  %v2060_v37 = vadd.f32 %v2059_v35, %v2058_v30 }
 0x14b   :  { %1766 = vmatmul.mubr.f32.gmra.mxu0 %v228_v31 }
 0x14c   :  { %v2115_v38 = vpop.f32.mrf.mxu1  ;;  %v913_v40 = vadd.f32 %v2060_v37, %v2686_v39 }
 0x14d   :  { %v2116_v41 = vadd.f32 %v2115_v38, %v2114_v33  ;;  %1871 = vmatmul.mubr.f32.gmra.mxu1 %v230_v36  ;;  %v2061_v19 = vpop.f32.mrf.mxu0 }
 0x14f   :  { %v1018_v42 = vadd.f32 %v2116_v41, %v913_v40  ;;  %v2062_v44 = vpop.f32.mrf.mxu0 }
 0x150   :  { %v2117_v43 = vpop.f32.mrf.mxu1  ;;  %v2063_v46 = vadd.f32 %v2062_v44, %v2061_v19 }
 0x152   :  { %v2118_v47 = vpop.f32.mrf.mxu1  ;;  %v918_v48 = vadd.f32 %v2063_v46, %v2688_v59 }
 0x153   :  { %v2119_v49 = vadd.f32 %v2118_v47, %v2117_v43  ;;  %v2064_v50 = vpop.f32.mrf.mxu0 }
 0x155   :  { %v1023_v51 = vadd.f32 %v2119_v49, %v918_v48  ;;  %v2065_v54 = vpop.f32.mrf.mxu0 }
 0x156   :  { %v2120_v53 = vpop.f32.mrf.mxu1  ;;  %v2066_v55 = vadd.f32 %v2065_v54, %v2064_v50 }
 0x158   :  { %v2121_v56 = vpop.f32.mrf.mxu1  ;;  %v923_v57 = vadd.f32 %v2066_v55, %v2690_v15 }
 0x159   :  { %v2122_v39 = vadd.f32 %v2121_v56, %v2120_v53  ;;  %v2067_v58 = vpop.f32.mrf.mxu0 }
 0x15b   :  { %v1028_v60 = vadd.f32 %v2122_v39, %v923_v57  ;;  %v2068_v61 = vpop.f32.mrf.mxu0 }
 0x15c   :  { %v2123_v26 = vpop.f32.mrf.mxu1  ;;  %v2069_v62 = vadd.f32 %v2068_v61, %v2067_v58 }
 0x15e   :  { %v2124_v63 = vpop.f32.mrf.mxu1  ;;  %v928_v1 = vadd.f32 %v2069_v62, %v2692_v34 }
 0x15f   :  { %v2125_v2 = vadd.f32 %v2124_v63, %v2123_v26  ;;  %v2158_v59 = vpop.f32.mrf.mxu0 }
 0x161   :  { %v1033_v4 = vadd.f32 %v2125_v2, %v928_v1  ;;  %v2214_v5 = vpop.f32.mrf.mxu1  ;;  %v2159_v6 = vpop.f32.mrf.mxu0 }
 0x162   :  { %v2160_v7 = vadd.f32 %v2159_v6, %v2158_v59 }
 0x163   :  { %v2215_v8 = vpop.f32.mrf.mxu1 }
 0x164   :  { %v1103_v9 = vadd.f32 %v2160_v7, %v2695_v52  ;;  %v2216_v10 = vadd.f32 %v2215_v8, %v2214_v5 }
 0x165   :  { %v2161_v15 = vpop.f32.mrf.mxu0 }
 0x166   :  { %v2711_v45 = vadd.f32 %v2216_v10, %v1103_v9 }
 0x167   :  { %v2162_v12 = vpop.f32.mrf.mxu0 }
 0x168   :  { %v2217_v11 = vpop.f32.mrf.mxu1  ;;  %v2163_v13 = vadd.f32 %v2162_v12, %v2161_v15 }
 0x16a   :  { %v2218_v14 = vpop.f32.mrf.mxu1  ;;  %v1108_v16 = vadd.f32 %v2163_v13, %v2698_v3 }
 0x16b   :  { %v2219_v34 = vadd.f32 %v2218_v14, %v2217_v11  ;;  %v2164_v18 = vpop.f32.mrf.mxu0 }
 0x16d   :  { %v2714_v20 = vadd.f32 %v2219_v34, %v1108_v16  ;;  %v2165_v22 = vpop.f32.mrf.mxu0 }
 0x16e   :  { %v2220_v21 = vpop.f32.mrf.mxu1  ;;  %v2166_v23 = vadd.f32 %v2165_v22, %v2164_v18 }
 0x170   :  { %v2221_v24 = vpop.f32.mrf.mxu1  ;;  %v1113_v52 = vadd.f32 %v2166_v23, %v2701_v17 }
 0x171   :  { %v2222_v25 = vadd.f32 %v2221_v24, %v2220_v21  ;;  %v2167_v0 = vpop.f32.mrf.mxu0 }
 0x173   :  { %v2717_v27 = vadd.f32 %v2222_v25, %v1113_v52  ;;  %v2168_v29 = vpop.f32.mrf.mxu0 }
 0x174   :  { %v2223_v28 = vpop.f32.mrf.mxu1  ;;  %v2169_v30 = vadd.f32 %v2168_v29, %v2167_v0 }
 0x176   :  { %v2224_v31 = vpop.f32.mrf.mxu1  ;;  %v1118_v3 = vadd.f32 %v2169_v30, %v2704_v32 }
 0x177   :  { %v2225_v33 = vadd.f32 %v2224_v31, %v2223_v28  ;;  %v2170_v35 = vpop.f32.mrf.mxu0 }
 0x179   :  { %v2720_v36 = vadd.f32 %v2225_v33, %v1118_v3  ;;  %v2171_v38 = vpop.f32.mrf.mxu0 }
 0x17a   :  { %v2226_v37 = vpop.f32.mrf.mxu1  ;;  %v2172_v40 = vadd.f32 %v2171_v38, %v2170_v35 }
 0x17c   :  { %v2227_v41 = vpop.f32.mrf.mxu1  ;;  %v1123_v19 = vadd.f32 %v2172_v40, %v1018_v42 }
 0x17d   :  { %v2228_v17 = vadd.f32 %v2227_v41, %v2226_v37  ;;  %v2173_v43 = vpop.f32.mrf.mxu0 }
 0x17f   :  { %v2722_v44 = vadd.f32 %v2228_v17, %v1123_v19  ;;  %v2174_v47 = vpop.f32.mrf.mxu0 }
 0x180   :  { %v2229_v46 = vpop.f32.mrf.mxu1  ;;  %v2175_v48 = vadd.f32 %v2174_v47, %v2173_v43 }
 0x182   :  { %v2230_v49 = vpop.f32.mrf.mxu1  ;;  %v1128_v50 = vadd.f32 %v2175_v48, %v1023_v51 }
 0x183   :  { %v2231_v53 = vadd.f32 %v2230_v49, %v2229_v46  ;;  %v2176_v32 = vpop.f32.mrf.mxu0 }
 0x185   :  { %v2724_v54 = vadd.f32 %v2231_v53, %v1128_v50  ;;  %v2177_v56 = vpop.f32.mrf.mxu0 }
 0x186   :  { %v2232_v55 = vpop.f32.mrf.mxu1  ;;  %v2178_v57 = vadd.f32 %v2177_v56, %v2176_v32 }
 0x188   :  { %v2233_v39 = vpop.f32.mrf.mxu1  ;;  %v1133_v58 = vadd.f32 %v2178_v57, %v1028_v60 }
 0x189   :  { %v2234_v26 = vadd.f32 %v2233_v39, %v2232_v55  ;;  %v2179_v42 = vpop.f32.mrf.mxu0 }
 0x18b   :  { %v2726_v61 = vadd.f32 %v2234_v26, %v1133_v58  ;;  %v2180_v63 = vpop.f32.mrf.mxu0 }
 0x18c   :  { %v2235_v62 = vpop.f32.mrf.mxu1  ;;  %v2181_v1 = vadd.f32 %v2180_v63, %v2179_v42 }
 0x18d   :  { %2876 = vst [vmem:[#allocation11_spill] sm:$0xff] %v2726_v61 }
 0x18e   :  { %v2236_v2 = vpop.f32.mrf.mxu1  ;;  %v1138_v59 = vadd.f32 %v2181_v1, %v1033_v4 }
 0x18f   :  { %v2237_v5 = vadd.f32 %v2236_v2, %v2235_v62  ;;  %v2270_v51 = vpop.f32.mrf.mxu0 }
 0x191   :  { %v2728_v6 = vadd.f32 %v2237_v5, %v1138_v59  ;;  %v2730_v7 = vpop.f32.mrf.mxu1  ;;  %v2271_v8 = vpop.f32.mrf.mxu0 }
 0x193   :  { %2877 = vst [vmem:[#allocation12_spill] sm:$0xff] %v2728_v6  ;;  %v2327_v9 = vpop.f32.mrf.mxu1 }
 0x195   :  { %v2273_v10 = vpop.f32.mrf.mxu0 }
 0x197   :  { %v2274_v60 = vpop.f32.mrf.mxu0 }
 0x198   :  { %v2732_v15 = vpop.f32.mrf.mxu1 }
 0x19a   :  { %v2734_v11 = vpop.f32.mrf.mxu1 }
 0x19b   :  { %v2276_v12 = vpop.f32.mrf.mxu0 }
 0x19d   :  { %v2277_v14 = vpop.f32.mrf.mxu0 }
 0x19e   :  { %v2736_v13 = vpop.f32.mrf.mxu1  ;;  %v2278_v61 = vadd.f32 %v2277_v14, %v2276_v12 }
 0x1a0   :  { %v2738_v16 = vpop.f32.mrf.mxu1 }
 0x1a1   :  { %v2740_v4 = vpop.f32.mrf.mxu0 }
 0x1a3   :  { %v2280_v18 = vpop.f32.mrf.mxu0 }
 0x1a4   :  { %v2742_v34 = vpop.f32.mrf.mxu1 }
 0x1a6   :  { %v2744_v21 = vpop.f32.mrf.mxu1 }
 0x1a7   :  { %v2746_v22 = vpop.f32.mrf.mxu0 }
 0x1a9   :  { %v2750_v24 = vpop.f32.mrf.mxu0 }
 0x1aa   :  { %v2748_v23 = vpop.f32.mrf.mxu1 }
 0x1ac   :  { %v2752_v52 = vpop.f32.mrf.mxu1 }
 0x1ad   :  { %v2754_v25 = vpop.f32.mrf.mxu0 }
 0x1af   :  { %v2758_v28 = vpop.f32.mrf.mxu0 }
 0x1b0   :  { %v2756_v0 = vpop.f32.mrf.mxu1 }
 0x1b2   :  { %v2760_v29 = vpop.f32.mrf.mxu1 }
 0x1b3   :  { %v2762_v30 = vpop.f32.mrf.mxu0 }
 0x1b5   :  { %v2766_v3 = vpop.f32.mrf.mxu0 }
 0x1b6   :  { %v2764_v31 = vpop.f32.mrf.mxu1 }
 0x1b7   :  { %2878 = vst [vmem:[#allocation13_spill] sm:$0xff] %v2764_v31 }
 0x1b8   :  { %v2768_v33 = vpop.f32.mrf.mxu1 }
 0x1b9   :  { %2879 = vst [vmem:[#allocation14_spill] sm:$0xff] %v2768_v33  ;;  %v2770_v35 = vpop.f32.mrf.mxu0 }
 0x1ba   :  { %2880 = vst [vmem:[#allocation15_spill] sm:$0xff] %v2770_v35 }
 0x1bb   :  { %v2774_v38 = vpop.f32.mrf.mxu0 }
 0x1bc   :  { %v2772_v37 = vpop.f32.mrf.mxu1  ;;  %2882 = vst [vmem:[#allocation17_spill] sm:$0xff] %v2774_v38 }
 0x1bd   :  { %2881 = vst [vmem:[#allocation16_spill] sm:$0xff] %v2772_v37  ;;  %v2272_v37 = vadd.f32 %v2271_v8, %v2270_v51 }
 0x1be   :  { %v2776_v40 = vpop.f32.mrf.mxu1 }
 0x1bf   :  { %2883 = vst [vmem:[#allocation18_spill] sm:$0xff] %v2776_v40  ;;  %v2382_v41 = vpop.f32.mrf.mxu0 }
 0x1c1   :  { %v2438_v19 = vpop.f32.mrf.mxu1  ;;  %v2383_v17 = vpop.f32.mrf.mxu0 }
 0x1c2   :  { %v2384_v35 = vadd.f32 %v2383_v17, %v2382_v41 }
 0x1c3   :  { %v2439_v43 = vpop.f32.mrf.mxu1 }
 0x1c4   :  { %v2440_v14 = vadd.f32 %v2439_v43, %v2438_v19 }
 0x1c5   :  { %v2385_v46 = vpop.f32.mrf.mxu0 }
 0x1c7   :  { %v2386_v48 = vpop.f32.mrf.mxu0 }
 0x1c8   :  { %v2441_v47 = vpop.f32.mrf.mxu1 }
 0x1ca   :  { %v2442_v49 = vpop.f32.mrf.mxu1 }
 0x1cb   :  { %v2388_v50 = vpop.f32.mrf.mxu0 }
 0x1cd   :  { %v2389_v32 = vpop.f32.mrf.mxu0 }
 0x1ce   :  { %v2778_v53 = vpop.f32.mrf.mxu1  ;;  %v2390_v41 = vadd.f32 %v2389_v32, %v2388_v50 }
 0x1d0   :  { %v2445_v55 = vpop.f32.mrf.mxu1 }
 0x1d1   :  { %v2391_v56 = vpop.f32.mrf.mxu0  ;;  %v2446_v32 = vadd.f32 %v2445_v55, %v2778_v53 }
 0x1d3   :  { %v2392_v39 = vpop.f32.mrf.mxu0 }
 0x1d4   :  { %v2780_v57 = vpop.f32.mrf.mxu1 }
 0x1d6   :  { %v2782_v58 = vpop.f32.mrf.mxu1 }
 0x1d7   :  { %v2784_v26 = vpop.f32.mrf.mxu0 }
 0x1d9   :  { %v2788_v62 = vpop.f32.mrf.mxu0 }
 0x1da   :  { %v2786_v42 = vpop.f32.mrf.mxu1 }
 0x1db   :  { %2884 = vst [vmem:[#allocation19_spill] sm:$0xff] %v2786_v42  ;;  %v1313_v42 = vadd.f32 %v2272_v37, %v2711_v45  ;;  %v2334_v37 = vadd.f32 %v2738_v16, %v2736_v13  ;;  %v2337_v13 = vadd.f32 %v2744_v21, %v2742_v34 }
 0x1dc   :  { %v2790_v63 = vpop.f32.mrf.mxu1 }
 0x1dd   :  { %2885 = vst [vmem:[#allocation20_spill] sm:$0xff] %v2790_v63  ;;  %v2792_v1 = vpop.f32.mrf.mxu0  ;;  %v2275_v63 = vadd.f32 %v2274_v60, %v2273_v10  ;;  %v2387_v10 = vadd.f32 %v2386_v48, %v2385_v46  ;;  %v1323_v60 = vadd.f32 %v2278_v61, %v2717_v27  ;;  %v2284_v27 = vadd.f32 %v2750_v24, %v2746_v22 }
 0x1de   :  { %v2443_v61 = vadd.f32 %v2442_v49, %v2441_v47  ;;  %v2393_v46 = vadd.f32 %v2392_v39, %v2391_v56 }
 0x1df   :  { %v2796_v59 = vpop.f32.mrf.mxu0  ;;  %v1318_v8 = vadd.f32 %v2275_v63, %v2714_v20  ;;  %v1333_v47 = vadd.f32 %v2284_v27, %v2722_v44  ;;  %v2290_v44 = vadd.f32 %v2766_v3, %v2762_v30  ;;  %v2899_v27 = vld [vmem:[#allocation14_spill] sm:$0xff] }
 0x1e0   :  { %v2794_v2 = vpop.f32.mrf.mxu1  ;;  %2887 = vst [vmem:[#allocation22_spill] sm:$0xff] %v2796_v59 }
 0x1e1   :  { %2886 = vst [vmem:[#allocation21_spill] sm:$0xff] %v2794_v2  ;;  %v2328_v2 = vadd.f32 %v2327_v9, %v2730_v7  ;;  %v2281_v7 = vadd.f32 %v2280_v18, %v2740_v4 }
 0x1e2   :  { %v2798_v5 = vpop.f32.mrf.mxu1 }
 0x1e3   :  { %2888 = vst [vmem:[#allocation23_spill] sm:$0xff] %v2798_v5  ;;  %v2800_v40 = vpop.f32.mrf.mxu0  ;;  %v1418_v51 = vadd.f32 %v2328_v2, %v1313_v42 }
 0x1e5   :  { %v2804_v33 = vpop.f32.mrf.mxu0  ;;  %v1523_v45 = vadd.f32 %v2384_v35, %v1418_v51 }
 0x1e6   :  { %v2802_v6 = vpop.f32.mrf.mxu1 }
 0x1e7   :  { %2889 = vst [vmem:[#allocation24_spill] sm:$0xff] %v2802_v6  ;;  %v1628_v42 = vadd.f32 %v2440_v14, %v1523_v45 }
 0x1e8   :  { %v2806_v31 = vpop.f32.mrf.mxu1 }
 0x1e9   :  { %2890 = vst [vmem:[#allocation25_spill] sm:$0xff] %v2806_v31  ;;  %v2809_v38 = vpop.f32.mrf.mxu0  ;;  %v2331_v31 = vadd.f32 %v2734_v11, %v2732_v15  ;;  %v1328_v15 = vadd.f32 %v2281_v7, %v2720_v36  ;;  %v2287_v36 = vadd.f32 %v2758_v28, %v2754_v25  ;;  %v2396_v25 = vadd.f32 %v2788_v62, %v2784_v26  ;;  %v2892_v26 = vld [vmem:[#allocation22_spill] sm:$0xff] }
 0x1ea   :  { %v2399_v62 = vadd.f32 %v2892_v26, %v2792_v1 }
 0x1eb   :  { %v2814_v5 = vpop.f32.mrf.mxu0  ;;  %v1423_v12 = vadd.f32 %v2331_v31, %v1318_v8  ;;  %v1433_v24 = vadd.f32 %v2337_v13, %v1328_v15  ;;  %v1338_v55 = vadd.f32 %v2287_v36, %v2724_v54  ;;  %v2896_v15 = vld [vmem:[#allocation19_spill] sm:$0xff] }
 0x1ec   :  { %v2812_v59 = vpop.f32.mrf.mxu1 }
 0x1ed   :  { %v1528_v63 = vadd.f32 %v2387_v10, %v1423_v12  ;;  %v1538_v8 = vadd.f32 %v2393_v46, %v1433_v24  ;;  %v2900_v46 = vld [vmem:[#allocation21_spill] sm:$0xff] }
 0x1ee   :  { %v2817_v6 = vpop.f32.mrf.mxu1 }
 0x1ef   :  { %2891 = vst [vmem:[#allocation26_spill] sm:$0xff] %v2817_v6  ;;  %v2494_v9 = vpop.f32.mrf.mxu0  ;;  %v1428_v6 = vadd.f32 %v2334_v37, %v1323_v60  ;;  %v1633_v43 = vadd.f32 %v2443_v61, %v1528_v63  ;;  %v2895_v63 = vld [vmem:[#allocation17_spill] sm:$0xff] }
 0x1f1   :  { %v2550_v17 = vpop.f32.mrf.mxu1  ;;  %v2495_v20 = vpop.f32.mrf.mxu0  ;;  %v1533_v16 = vadd.f32 %v2390_v41, %v1428_v6  ;;  %v2340_v6 = vadd.f32 %v2752_v52, %v2748_v23  ;;  %v2449_v23 = vadd.f32 %v2782_v58, %v2780_v57  ;;  %v2894_v58 = vld [vmem:[#allocation15_spill] sm:$0xff] }
 0x1f2   :  { %v2496_v2 = vadd.f32 %v2495_v20, %v2494_v9  ;;  %v2343_v9 = vadd.f32 %v2760_v29, %v2756_v0 }
 0x1f3   :  { %v2551_v11 = vpop.f32.mrf.mxu1  ;;  %v2497_v35 = vpop.f32.mrf.mxu0  ;;  %v1638_v21 = vadd.f32 %v2446_v32, %v1533_v16  ;;  %v1438_v60 = vadd.f32 %v2340_v6, %v1333_v47  ;;  %v1643_v14 = vadd.f32 %v2449_v23, %v1538_v8  ;;  %v2904_v6 = vld [vmem:[#allocation18_spill] sm:$0xff] }
 0x1f4   :  { %v1733_v4 = vadd.f32 %v2496_v2, %v1628_v42  ;;  %v2552_v18 = vadd.f32 %v2551_v11, %v2550_v17  ;;  %v1443_v41 = vadd.f32 %v2343_v9, %v1338_v55  ;;  %v2893_v17 = vld [vmem:[#allocation11_spill] sm:$0xff]  ;;  %v2293_v2 = vadd.f32 %v2895_v63, %v2894_v58  ;;  %v2897_v11 = vld [vmem:[#allocation20_spill] sm:$0xff] }
 0x1f5   :  { %v2553_v31 = vpop.f32.mrf.mxu1  ;;  %v2498_v19 = vpop.f32.mrf.mxu0  ;;  %v1543_v37 = vadd.f32 %v2396_v25, %v1438_v60  ;;  %v1343_v20 = vadd.f32 %v2290_v44, %v2893_v17  ;;  %v2452_v0 = vadd.f32 %v2897_v11, %v2896_v15 }
 0x1f6   :  { %v1838_v48 = vadd.f32 %v2552_v18, %v1733_v4  ;;  %v2499_v50 = vadd.f32 %v2498_v19, %v2497_v35  ;;  %v2898_v35 = vld [vmem:[#allocation13_spill] sm:$0xff]  ;;  %v1548_v4 = vadd.f32 %v2399_v62, %v1443_v41 }
 0x1f7   :  { %v2554_v51 = vpop.f32.mrf.mxu1  ;;  %v2500_v22 = vpop.f32.mrf.mxu0  ;;  %v2346_v61 = vadd.f32 %v2899_v27, %v2898_v35  ;;  %v1648_v16 = vadd.f32 %v2452_v0, %v1543_v37 }
 0x1f8   :  { %1876 = vst [vmem:[#allocation7] sm:$0xff] %v1838_v48  ;;  %v1738_v49 = vadd.f32 %v2499_v50, %v1633_v43  ;;  %v2555_v34 = vadd.f32 %v2554_v51, %v2553_v31  ;;  %v2402_v31 = vadd.f32 %v2804_v33, %v2800_v40  ;;  %v2901_v48 = vld [vmem:[#allocation23_spill] sm:$0xff]  ;;  %v2405_v40 = vadd.f32 %v2814_v5, %v2809_v38  ;;  %v2907_v38 = vld [vmem:[#allocation26_spill] sm:$0xff] }
 0x1f9   :  { %v2556_v56 = vpop.f32.mrf.mxu1  ;;  %v2501_v39 = vpop.f32.mrf.mxu0  ;;  %v2455_v50 = vadd.f32 %v2901_v48, %v2900_v46  ;;  %v1448_v51 = vadd.f32 %v2346_v61, %v1343_v20  ;;  %v2461_v5 = vadd.f32 %v2907_v38, %v2812_v59 }
 0x1fa   :  { %v1843_v28 = vadd.f32 %v2555_v34, %v1738_v49  ;;  %v2502_v53 = vadd.f32 %v2501_v39, %v2500_v22  ;;  %v2902_v22 = vld [vmem:[#allocation12_spill] sm:$0xff] }
 0x1fb   :  { %v2557_v45 = vpop.f32.mrf.mxu1  ;;  %v2503_v10 = vpop.f32.mrf.mxu0  ;;  %v1348_v24 = vadd.f32 %v2293_v2, %v2902_v22  ;;  %v2903_v34 = vld [vmem:[#allocation16_spill] sm:$0xff]  ;;  %v1553_v33 = vadd.f32 %v2402_v31, %v1448_v51 }
 0x1fc   :  { %1877 = vst [vmem:[#allocation7 + $0x8] sm:$0xff] %v1843_v28  ;;  %v1743_v52 = vadd.f32 %v2502_v53, %v1638_v21  ;;  %v2558_v7 = vadd.f32 %v2557_v45, %v2556_v56  ;;  %v2349_v21 = vadd.f32 %v2904_v6, %v2903_v34  ;;  %v1653_v56 = vadd.f32 %v2455_v50, %v1548_v4  ;;  %v2905_v45 = vld [vmem:[#allocation24_spill] sm:$0xff] }
 0x1fd   :  { %v2559_v12 = vpop.f32.mrf.mxu1  ;;  %v2504_v54 = vpop.f32.mrf.mxu0 }
 0x1fe   :  { %v1848_v30 = vadd.f32 %v2558_v7, %v1743_v52  ;;  %v2505_v3 = vadd.f32 %v2504_v54, %v2503_v10  ;;  %v1453_v44 = vadd.f32 %v2349_v21, %v1348_v24  ;;  %v2906_v10 = vld [vmem:[#allocation25_spill] sm:$0xff] }
 0x1ff   :  { %v2560_v42 = vpop.f32.mrf.mxu1  ;;  %v2506_v57 = vpop.f32.mrf.mxu0  ;;  %v2458_v60 = vadd.f32 %v2906_v10, %v2905_v45 }
 0x200   :  { %1878 = vst [vmem:[#allocation7 + $0x10] sm:$0xff] %v1848_v30  ;;  %v1748_v29 = vadd.f32 %v2505_v3, %v1643_v14  ;;  %v2561_v1 = vadd.f32 %v2560_v42, %v2559_v12  ;;  %v1558_v62 = vadd.f32 %v2405_v40, %v1453_v44 }
 0x201   :  { %v2562_v18 = vpop.f32.mrf.mxu1  ;;  %v2507_v13 = vpop.f32.mrf.mxu0  ;;  %v1658_v26 = vadd.f32 %v2458_v60, %v1553_v33 }
 0x202   :  { %v1853_v19 = vadd.f32 %v2561_v1, %v1748_v29  ;;  %v2508_v43 = vadd.f32 %v2507_v13, %v2506_v57  ;;  %v1663_v20 = vadd.f32 %v2461_v5, %v1558_v62 }
 0x203   :  { %v2563_v36 = vpop.f32.mrf.mxu1  ;;  %v2509_v32 = vpop.f32.mrf.mxu0 }
 0x204   :  { %1879 = vst [vmem:[#allocation7 + $0x18] sm:$0xff] %v1853_v19  ;;  %v1753_v47 = vadd.f32 %v2508_v43, %v1648_v16  ;;  %v2564_v49 = vadd.f32 %v2563_v36, %v2562_v18 }
 0x205   :  { %v2565_v39 = vpop.f32.mrf.mxu1  ;;  %v2510_v8 = vpop.f32.mrf.mxu0 }
 0x206   :  { %v1858_v25 = vadd.f32 %v2564_v49, %v1753_v47  ;;  %v2511_v28 = vadd.f32 %v2510_v8, %v2509_v32 }
 0x207   :  { %v2566_v53 = vpop.f32.mrf.mxu1  ;;  %v2512_v55 = vpop.f32.mrf.mxu0 }
 0x208   :  { %1880 = vst [vmem:[#allocation7 + $0x20] sm:$0xff] %v1858_v25  ;;  %v1758_v23 = vadd.f32 %v2511_v28, %v1653_v56  ;;  %v2567_v52 = vadd.f32 %v2566_v53, %v2565_v39 }
 0x209   :  { %v2568_v7 = vpop.f32.mrf.mxu1  ;;  %v2513_v9 = vpop.f32.mrf.mxu0 }
 0x20a   :  { %v1863_v12 = vadd.f32 %v2567_v52, %v1758_v23  ;;  %v2514_v54 = vadd.f32 %v2513_v9, %v2512_v55 }
 0x20b   :  { %v2569_v14 = vpop.f32.mrf.mxu1  ;;  %v2515_v37 = vpop.f32.mrf.mxu0 }
 0x20c   :  { %1881 = vst [vmem:[#allocation7 + $0x28] sm:$0xff] %v1863_v12  ;;  %v1763_v30 = vadd.f32 %v2514_v54, %v1658_v26  ;;  %v2570_v3 = vadd.f32 %v2569_v14, %v2568_v7 }
 0x20d   :  { %v2571_v41 = vpop.f32.mrf.mxu1  ;;  %v2516_v17 = vpop.f32.mrf.mxu0 }
 0x20e   :  { %v1868_v42 = vadd.f32 %v2570_v3, %v1763_v30  ;;  %v2517_v57 = vadd.f32 %v2516_v17, %v2515_v37 }
 0x20f   :  { %v2572_v58 = vpop.f32.mrf.mxu1 }
 0x210   :  { %1882 = vst [vmem:[#allocation7 + $0x30] sm:$0xff] %v1868_v42  ;;  %v1768_v63 = vadd.f32 %v2517_v57, %v1663_v20  ;;  %v2573_v2 = vadd.f32 %v2572_v58, %v2571_v41 }
 0x212   :  { %v1873_v15 = vadd.f32 %v2573_v2, %v1768_v63 }
 0x214   :  { %1883 = vst [vmem:[#allocation7 + $0x38] sm:$0xff] %v1873_v15 }
 0x215   :  { %2632 = shalt.err (!%p2629_p0)
}
 0x216   :  { %1895 = dma.vmem_to_hbm [thread:$0]  %s1890_s1, 1024, %s2875_s2, [#allocation4], %s2651_s19, %s2651_s19, %s2652_s20  }
 0x217   :  { %2645 = dma.done.wait [#allocation4], 1024  }
 0x218   :  { %2646 = vsyncadd [#allocation4], 4294966272 }
 0x219   :  { %1899 = vsyncpa [#allocation3], 1 }
 0x21a   :  { %1900 = vsyncpa [#allocation6], 1 }
 0x21b   :  { %1901 = vsyncpa [#allocation4], 1 }

</bundles_post_ra>
